<compile_context>
chip_gen: v7x
topology: tpu7x:2x2x1
jax: 0.10.0
libtpu: 0.0.40
codegen_flags: <defaults>
</compile_context>

<pallas_src>
import functools
import math

import jax
import jax.numpy as jnp
from jax import lax
from jax.experimental import pallas as pl
from jax.experimental.pallas import tpu as pltpu


# ---------------------------------------------------------------------------
# helpers
# ---------------------------------------------------------------------------

def _token_tile(n, target=256):
    """Largest token tile <= target that divides n (multiple of 8), else full n."""
    t = min(n, target)
    while t > 8 and n % t:
        t -= 8
    return t if t > 0 and n % t == 0 else n


def _vmem_limit_bytes(block_specs):
    """Explicit scoped-VMEM budget: double-buffered blocks + headroom, capped so the
    same choice also fits v7x (64 MiB physical / 32 MiB default scoped)."""
    need = 0
    for shape, dtype in block_specs:
        need += 2 * int(math.prod(shape)) * jnp.dtype(dtype).itemsize
    need += 2 << 20
    return int(min(max(need, 16 << 20), 32 << 20))


# ---------------------------------------------------------------------------
# Multi-head self-attention: grid = (batch, head); head axis accumulates into o_ref
# ---------------------------------------------------------------------------

def _mha_kernel(x_ref, wq_ref, wk_ref, wv_ref, bq_ref, bk_ref, bv_ref,
                wo_ref, bo_ref, o_ref, *, scale, mxu_dtype):
    head = pl.program_id(1)
    x = x_ref[...]                                                      # (S, H)

    q = jnp.dot(x, wq_ref[...], preferred_element_type=jnp.float32) + bq_ref[...]
    k = jnp.dot(x, wk_ref[...], preferred_element_type=jnp.float32) + bk_ref[...]
    v = jnp.dot(x, wv_ref[...], preferred_element_type=jnp.float32) + bv_ref[...]

    s = lax.dot_general(q.astype(mxu_dtype), k.astype(mxu_dtype),
                        dimension_numbers=(((1,), (1,)), ((), ())),
                        preferred_element_type=jnp.float32) * scale     # (S, S)
    m = s.max(axis=-1, keepdims=True)
    p = jnp.exp(s - m)
    p = p * pl.reciprocal(jnp.sum(p, axis=-1, keepdims=True), approx=True)

    ctx = jnp.dot(p.astype(mxu_dtype), v.astype(mxu_dtype),
                  preferred_element_type=jnp.float32)                   # (S, Dh)
    contrib = jnp.dot(ctx.astype(mxu_dtype), wo_ref[...],
                      preferred_element_type=jnp.float32)               # (S, H)

    @pl.when(head == 0)
    def _init():
        o_ref[...] = jnp.broadcast_to(bo_ref[...], o_ref.shape).astype(o_ref.dtype)

    o_ref[...] += contrib.astype(o_ref.dtype)


def mha_forward(x, wq, wk, wv, bq, bk, bv, wo, bo, *, num_heads,
                mxu_dtype=jnp.bfloat16):
    """x: (B, S, H) f32; w*: (H, H) stored (in, out); b*: (H,)."""
    B, S, H = x.shape
    Dh = H // num_heads
    scale = 1.0 / math.sqrt(Dh)

    def per_head_w(w):                          # (H, H) -> (nh, H, Dh)
        return w.reshape(H, num_heads, Dh).transpose(1, 0, 2).astype(mxu_dtype)

    def per_head_b(b):                          # (H,) -> (nh, 1, Dh)
        return b.reshape(num_heads, 1, Dh).astype(jnp.float32)

    wqh, wkh, wvh = per_head_w(wq), per_head_w(wk), per_head_w(wv)
    bqh, bkh, bvh = per_head_b(bq), per_head_b(bk), per_head_b(bv)
    woh = wo.reshape(num_heads, Dh, H).astype(mxu_dtype)
    bo2 = bo.reshape(1, H).astype(jnp.float32)

    vmem = _vmem_limit_bytes(
        [((S, H), mxu_dtype)] + [((H, Dh), mxu_dtype)] * 3 +
        [((1, Dh), jnp.float32)] * 3 +
        [((Dh, H), mxu_dtype), ((1, H), jnp.float32), ((S, H), jnp.float32)])

    out = pl.pallas_call(
        functools.partial(_mha_kernel, scale=scale, mxu_dtype=mxu_dtype),
        out_shape=jax.ShapeDtypeStruct((B, S, H), jnp.float32),
        grid_spec=pltpu.PrefetchScalarGridSpec(
            num_scalar_prefetch=0,
            grid=(B, num_heads),
            in_specs=[
                pl.BlockSpec((None, S, H), lambda b, h: (b, 0, 0)),    # x (per batch)
                pl.BlockSpec((None, H, Dh), lambda b, h: (h, 0, 0)),   # Wq head slice
                pl.BlockSpec((None, H, Dh), lambda b, h: (h, 0, 0)),   # Wk head slice
                pl.BlockSpec((None, H, Dh), lambda b, h: (h, 0, 0)),   # Wv head slice
                pl.BlockSpec((None, 1, Dh), lambda b, h: (h, 0, 0)),   # bq
                pl.BlockSpec((None, 1, Dh), lambda b, h: (h, 0, 0)),   # bk
                pl.BlockSpec((None, 1, Dh), lambda b, h: (h, 0, 0)),   # bv
                pl.BlockSpec((None, Dh, H), lambda b, h: (h, 0, 0)),   # Wo head slice
                pl.BlockSpec((1, H), lambda b, h: (0, 0)),             # bo
            ],
            out_specs=pl.BlockSpec((None, S, H), lambda b, h: (b, 0, 0)),
        ),
        compiler_params=pltpu.CompilerParams(
            dimension_semantics=("parallel", "arbitrary"),
            vmem_limit_bytes=vmem),
    )(x.astype(mxu_dtype), wqh, wkh, wvh, bqh, bkh, bvh, woh, bo2)
    return out


# ---------------------------------------------------------------------------
# Residual add + LayerNorm over token tiles
# ---------------------------------------------------------------------------

def _add_ln_kernel(x_ref, r_ref, g_ref, b_ref, o_ref, *, eps):
    v = x_ref[...] + r_ref[...]
    mu = jnp.mean(v, axis=-1, keepdims=True)
    c = v - mu
    var = jnp.mean(c * c, axis=-1, keepdims=True)
    o_ref[...] = (c * lax.rsqrt(var + eps) * g_ref[...] + b_ref[...]).astype(o_ref.dtype)


def add_layernorm(x, residual, gamma, beta, *, eps=1e-5):
    B, S, H = x.shape
    N = B * S
    tn = _token_tile(N)
    vmem = _vmem_limit_bytes([((tn, H), jnp.float32)] * 3 + [((1, H), jnp.float32)] * 2)
    out = pl.pallas_call(
        functools.partial(_add_ln_kernel, eps=eps),
        out_shape=jax.ShapeDtypeStruct((N, H), jnp.float32),
        grid_spec=pltpu.PrefetchScalarGridSpec(
            num_scalar_prefetch=0,
            grid=(N // tn,),
            in_specs=[
                pl.BlockSpec((tn, H), lambda i: (i, 0)),
                pl.BlockSpec((tn, H), lambda i: (i, 0)),
                pl.BlockSpec((1, H), lambda i: (0, 0)),
                pl.BlockSpec((1, H), lambda i: (0, 0)),
            ],
            out_specs=pl.BlockSpec((tn, H), lambda i: (i, 0)),
        ),
        compiler_params=pltpu.CompilerParams(
            dimension_semantics=("parallel",), vmem_limit_bytes=vmem),
    )(x.reshape(N, H).astype(jnp.float32),
      residual.reshape(N, H).astype(jnp.float32),
      gamma.reshape(1, H).astype(jnp.float32),
      beta.reshape(1, H).astype(jnp.float32))
    return out.reshape(B, S, H)


# ---------------------------------------------------------------------------
# SimpleMoE — fused: one K=H matmul into all experts, gate applied to hidden blocks,
# one K=E*EH matmul back to H.  Grid = token tiles only (no expert reduction axis).
# ---------------------------------------------------------------------------

def _moe_kernel(x_ref, gw_ref, gb_ref, sel_ref, w1c_ref, b1c_ref, w2c_ref, b2e_ref,
                o_ref, *, mxu_dtype):
    x = x_ref[...]                                                            # (tn, H)

    # Gate: softmax(x @ Wg + bg); denominator via approximate reciprocal (EUP slot).
    logits = jnp.dot(x, gw_ref[...], preferred_element_type=jnp.float32) + gb_ref[...]
    m = logits.max(axis=-1, keepdims=True)
    p = jnp.exp(logits - m)
    gate = p * pl.reciprocal(jnp.sum(p, axis=-1, keepdims=True), approx=True)  # (tn, E)

    # Broadcast gate over each expert's EH-wide hidden block with a tiny K=E selection
    # matmul (no lane slicing / iota / cross-lane reduce per expert).
    gate_full = jnp.dot(gate, sel_ref[...], preferred_element_type=jnp.float32)  # (tn, E*EH)

    # All experts' first layers as one fused contraction.
    h = jnp.dot(x, w1c_ref[...], preferred_element_type=jnp.float32) + b1c_ref[...]
    h = jnp.maximum(h, 0.0) * gate_full

    # Second layers: the expert sum falls out of one K=E*EH contraction.
    y = jnp.dot(h.astype(mxu_dtype), w2c_ref[...], preferred_element_type=jnp.float32)
    y = y + jnp.dot(gate, b2e_ref[...], preferred_element_type=jnp.float32)   # sum_e g_e*b2_e
    o_ref[...] = y.astype(o_ref.dtype)


def moe_forward(x, gate_w, gate_b, w1, b1, w2, b2, *, mxu_dtype=jnp.bfloat16):
    """x: (B, S, H); gate_w: (H, E); gate_b: (1, E);
       w1: (E, H, EH); b1: (E, EH); w2: (E, EH, H); b2: (E, H)  (all x @ W oriented)."""
    B, S, H = x.shape
    E, _, EH = w1.shape
    N = B * S
    tn = _token_tile(N)

    w1c = w1.transpose(1, 0, 2).reshape(H, E * EH).astype(mxu_dtype)   # expert-major cols
    b1c = b1.reshape(1, E * EH).astype(jnp.float32)
    w2c = w2.reshape(E * EH, H).astype(mxu_dtype)                      # expert-major rows
    b2e = b2.astype(jnp.float32)                                       # (E, H)
    sel = jnp.repeat(jnp.eye(E, dtype=jnp.float32), EH, axis=1)        # (E, E*EH) 0/1 selector
    gwc = gate_w.astype(mxu_dtype)
    gbc = gate_b.reshape(1, E).astype(jnp.float32)

    vmem = _vmem_limit_bytes([
        ((tn, H), mxu_dtype), ((H, E), mxu_dtype), ((1, E), jnp.float32),
        ((E, E * EH), jnp.float32), ((H, E * EH), mxu_dtype), ((1, E * EH), jnp.float32),
        ((E * EH, H), mxu_dtype), ((E, H), jnp.float32), ((tn, H), jnp.float32)])

    out = pl.pallas_call(
        functools.partial(_moe_kernel, mxu_dtype=mxu_dtype),
        out_shape=jax.ShapeDtypeStruct((N, H), jnp.float32),
        grid_spec=pltpu.PrefetchScalarGridSpec(
            num_scalar_prefetch=0,
            grid=(N // tn,),
            in_specs=[
                pl.BlockSpec((tn, H), lambda i: (i, 0)),       # x tile
                pl.BlockSpec((H, E), lambda i: (0, 0)),        # gate weight
                pl.BlockSpec((1, E), lambda i: (0, 0)),        # gate bias
                pl.BlockSpec((E, E * EH), lambda i: (0, 0)),   # gate -> hidden selector
                pl.BlockSpec((H, E * EH), lambda i: (0, 0)),   # W1 (all experts)
                pl.BlockSpec((1, E * EH), lambda i: (0, 0)),   # b1 (all experts)
                pl.BlockSpec((E * EH, H), lambda i: (0, 0)),   # W2 (all experts)
                pl.BlockSpec((E, H), lambda i: (0, 0)),        # b2 (per expert)
            ],
            out_specs=pl.BlockSpec((tn, H), lambda i: (i, 0)),
        ),
        compiler_params=pltpu.CompilerParams(
            dimension_semantics=("parallel",), vmem_limit_bytes=vmem),
    )(x.reshape(N, H).astype(mxu_dtype), gwc, gbc, sel, w1c, b1c, w2c, b2e)
    return out.reshape(B, S, H)


# ---------------------------------------------------------------------------
# LM head (token-tiled matmul + bias)
# ---------------------------------------------------------------------------

def _linear_kernel(x_ref, w_ref, b_ref, o_ref):
    o_ref[...] = (jnp.dot(x_ref[...], w_ref[...], preferred_element_type=jnp.float32)
                  + b_ref[...]).astype(o_ref.dtype)


def linear_forward(x, w, b, *, mxu_dtype=jnp.bfloat16):
    """x: (B, S, H); w: (H, V) stored (in, out); b: (V,)."""
    B, S, H = x.shape
    V = w.shape[1]
    N = B * S
    tn = _token_tile(N)
    vmem = _vmem_limit_bytes([((tn, H), mxu_dtype), ((H, V), mxu_dtype),
                              ((1, V), jnp.float32), ((tn, V), jnp.float32)])
    out = pl.pallas_call(
        _linear_kernel,
        out_shape=jax.ShapeDtypeStruct((N, V), jnp.float32),
        grid_spec=pltpu.PrefetchScalarGridSpec(
            num_scalar_prefetch=0,
            grid=(N // tn,),
            in_specs=[
                pl.BlockSpec((tn, H), lambda i: (i, 0)),
                pl.BlockSpec((H, V), lambda i: (0, 0)),
                pl.BlockSpec((1, V), lambda i: (0, 0)),
            ],
            out_specs=pl.BlockSpec((tn, V), lambda i: (i, 0)),
        ),
        compiler_params=pltpu.CompilerParams(
            dimension_semantics=("parallel",), vmem_limit_bytes=vmem),
    )(x.reshape(N, H).astype(mxu_dtype), w.astype(mxu_dtype),
      b.reshape(1, V).astype(jnp.float32))
    return out.reshape(B, S, V)


# ---------------------------------------------------------------------------
# Full MiniMoETransformer forward (eval-mode semantics)
# ---------------------------------------------------------------------------

def transformer_forward(params, input_ids, *, num_heads, mxu_dtype=jnp.bfloat16):
    B, S = input_ids.shape
    # TODO(synk): embedding-table gather stays in plain JAX (XLA gather); a Pallas
    # scalar-prefetch row gather is not worth it for this tiny table.
    x = jnp.take(params["embed"], input_ids, axis=0) + params["pos_embed"][:, :S, :]
    x = x.astype(jnp.float32)
    for lp in params["layers"]:
        attn = mha_forward(x, lp["wq"], lp["wk"], lp["wv"], lp["bq"], lp["bk"], lp["bv"],
                           lp["wo"], lp["bo"], num_heads=num_heads, mxu_dtype=mxu_dtype)
        # TODO(synk): dropout is treated as eval-mode identity (no in-kernel RNG).
        x = add_layernorm(x, attn, lp["ln1_g"], lp["ln1_b"])
        moe = moe_forward(x, lp["gate_w"], lp["gate_b"], lp["w1"], lp["b1"],
                          lp["w2"], lp["b2"], mxu_dtype=mxu_dtype)
        x = add_layernorm(x, moe, lp["ln2_g"], lp["ln2_b"])
    x = add_layernorm(x, jnp.zeros_like(x), params["ln_g"], params["ln_b"])  # final LN
    return linear_forward(x, params["head_w"], params["head_b"], mxu_dtype=mxu_dtype)


# ---------------------------------------------------------------------------
# Pure-JAX reference (mirrors the PyTorch module, eval mode)
# ---------------------------------------------------------------------------

_PREC = lax.Precision.HIGHEST


def _ref_ln(x, g, b, eps=1e-5):
    mu = x.mean(axis=-1, keepdims=True)
    var = ((x - mu) ** 2).mean(axis=-1, keepdims=True)
    return (x - mu) * lax.rsqrt(var + eps) * g + b


def _ref_mha(x, lp, num_heads):
    B, S, H = x.shape
    Dh = H // num_heads
    q = jnp.dot(x, lp["wq"], precision=_PREC) + lp["bq"]
    k = jnp.dot(x, lp["wk"], precision=_PREC) + lp["bk"]
    v = jnp.dot(x, lp["wv"], precision=_PREC) + lp["bv"]

    def split(t):
        return t.reshape(B, S, num_heads, Dh).transpose(0, 2, 1, 3)

    qh, kh, vh = split(q), split(k), split(v)
    s = jnp.einsum("bhqd,bhkd->bhqk", qh, kh, precision=_PREC) / math.sqrt(Dh)
    p = jax.nn.softmax(s, axis=-1)
    ctx = jnp.einsum("bhqk,bhkd->bhqd", p, vh, precision=_PREC)
    ctx = ctx.transpose(0, 2, 1, 3).reshape(B, S, H)
    return jnp.dot(ctx, lp["wo"], precision=_PREC) + lp["bo"]


def _ref_moe(x, lp):
    B, S, H = x.shape
    xf = x.reshape(-1, H)
    gate = jax.nn.softmax(jnp.dot(xf, lp["gate_w"], precision=_PREC) + lp["gate_b"], axis=-1)
    outs = []
    for e in range(lp["w1"].shape[0]):
        h = jnp.maximum(jnp.dot(xf, lp["w1"][e], precision=_PREC) + lp["b1"][e], 0.0)
        outs.append(jnp.dot(h, lp["w2"][e], precision=_PREC) + lp["b2"][e])
    outs = jnp.stack(outs, axis=1)                                      # (N, E, H)
    return (gate[..., None] * outs).sum(axis=1).reshape(B, S, H)


def reference_forward(params, input_ids, *, num_heads):
    B, S = input_ids.shape
    x = jnp.take(params["embed"], input_ids, axis=0) + params["pos_embed"][:, :S, :]
    for lp in params["layers"]:
        x = _ref_ln(x + _ref_mha(x, lp, num_heads), lp["ln1_g"], lp["ln1_b"])
        x = _ref_ln(x + _ref_moe(x, lp), lp["ln2_g"], lp["ln2_b"])
    x = _ref_ln(x, params["ln_g"], params["ln_b"])
    return jnp.dot(x, params["head_w"], precision=_PREC) + params["head_b"]


# ---------------------------------------------------------------------------
# Parameter init (PyTorch-style uniform Linear init; weights stored (in, out))
# ---------------------------------------------------------------------------

def _linear_init(key, fan_in, fan_out):
    kw, kb = jax.random.split(key)
    bound = 1.0 / math.sqrt(fan_in)
    w = jax.random.uniform(kw, (fan_in, fan_out), jnp.float32, -bound, bound)
    b = jax.random.uniform(kb, (fan_out,), jnp.float32, -bound, bound)
    return w, b


def init_params(key, *, vocab_size, hidden_size, num_layers, num_experts,
                expert_hidden, max_len):
    H, E, EH = hidden_size, num_experts, expert_hidden
    k_embed, k_pos, k_head, k_layers = jax.random.split(key, 4)
    params = {
        "embed": 0.5 * jax.random.normal(k_embed, (vocab_size, H), jnp.float32),
        "pos_embed": 0.1 * jax.random.normal(k_pos, (1, max_len, H), jnp.float32),
        "ln_g": jnp.ones((H,), jnp.float32),
        "ln_b": jnp.zeros((H,), jnp.float32),
        "layers": [],
    }
    params["head_w"], params["head_b"] = _linear_init(k_head, H, vocab_size)
    for li in range(num_layers):
        lk = jax.random.fold_in(k_layers, li)
        ks = jax.random.split(lk, 7)
        wq, bq = _linear_init(ks[0], H, H)
        wk, bk = _linear_init(ks[1], H, H)
        wv, bv = _linear_init(ks[2], H, H)
        wo, bo = _linear_init(ks[3], H, H)
        gate_w, gate_b = _linear_init(ks[4], H, E)
        w1, b1, w2, b2 = [], [], [], []
        for e in range(E):
            we1, be1 = _linear_init(jax.random.fold_in(ks[5], e), H, EH)
            we2, be2 = _linear_init(jax.random.fold_in(ks[6], e), EH, H)
            w1.append(we1); b1.append(be1); w2.append(we2); b2.append(be2)
        params["layers"].append(dict(
            wq=wq, bq=bq, wk=wk, bk=bk, wv=wv, bv=bv, wo=wo, bo=bo,
            ln1_g=jnp.ones((H,), jnp.float32), ln1_b=jnp.zeros((H,), jnp.float32),
            ln2_g=jnp.ones((H,), jnp.float32), ln2_b=jnp.zeros((H,), jnp.float32),
            gate_w=gate_w, gate_b=gate_b.reshape(1, E),
            w1=jnp.stack(w1), b1=jnp.stack(b1), w2=jnp.stack(w2), b2=jnp.stack(b2)))
    return params


if __name__ == "__main__":
    # Small shapes consistent with the module defaults:
    # hidden_size=256, num_heads=4, num_experts=4, expert_hidden=128; batch=2, seq=8.
    vocab_size = 512
    hidden_size = 256
    num_layers = 2
    num_heads = 4
    num_experts = 4
    expert_hidden = 128
    max_len = 128
    batch, seq = 2, 8

    root = jax.random.PRNGKey(0)
    k_params, k_data = jax.random.split(root)
    params = init_params(k_params, vocab_size=vocab_size, hidden_size=hidden_size,
                         num_layers=num_layers, num_experts=num_experts,
                         expert_hidden=expert_hidden, max_len=max_len)
    input_ids = jax.random.randint(k_data, (batch, seq), 0, vocab_size, dtype=jnp.int32)

    # Isolated check of the fused MoE kernel against the per-expert reference (f32).
    lp0 = params["layers"][0]
    x_test = jax.random.normal(jax.random.fold_in(root, 7),
                               (batch, seq, hidden_size), jnp.float32)
    moe_ker = jax.jit(functools.partial(moe_forward, mxu_dtype=jnp.float32))(
        x_test, lp0["gate_w"], lp0["gate_b"], lp0["w1"], lp0["b1"], lp0["w2"], lp0["b2"])
    moe_ker = jax.block_until_ready(moe_ker)
    err_moe = float(jnp.max(jnp.abs(moe_ker - _ref_moe(x_test, lp0))))
    assert err_moe < 5e-3, f"fused MoE kernel max abs err {err_moe}"

    # Full transformer: bf16-MXU (default / perf path) and f32 (tight check).
    fwd_bf16 = jax.jit(functools.partial(transformer_forward, num_heads=num_heads,
                                         mxu_dtype=jnp.bfloat16))
    fwd_f32 = jax.jit(functools.partial(transformer_forward, num_heads=num_heads,
                                        mxu_dtype=jnp.float32))

    logits_bf16 = jax.block_until_ready(fwd_bf16(params, input_ids))
    logits_f32 = jax.block_until_ready(fwd_f32(params, input_ids))
    ref = jax.block_until_ready(
        jax.jit(functools.partial(reference_forward, num_heads=num_heads))(params, input_ids))

    assert logits_bf16.shape == (batch, seq, vocab_size), logits_bf16.shape
    err_f32 = float(jnp.max(jnp.abs(logits_f32 - ref)))
    err_bf16 = float(jnp.max(jnp.abs(logits_bf16 - ref)))
    assert err_f32 < 2e-2, f"f32 kernel max abs err {err_f32}"
    assert err_bf16 < 1e-1, f"bf16 kernel max abs err {err_bf16}"
    print("KERNEL_OK")
</pallas_src>

<mosaic_0001>
module attributes {stable_mosaic.version = 11 : i64} {
  func.func @_moe_kernel(%arg0: i32, %arg1: memref<16x256xf32, #tpu.memory_space<vmem>>, %arg2: memref<256x4xf32, #tpu.memory_space<vmem>>, %arg3: memref<1x4xf32, #tpu.memory_space<vmem>>, %arg4: memref<4x512xf32, #tpu.memory_space<vmem>>, %arg5: memref<256x512xf32, #tpu.memory_space<vmem>>, %arg6: memref<1x512xf32, #tpu.memory_space<vmem>>, %arg7: memref<512x256xf32, #tpu.memory_space<vmem>>, %arg8: memref<4x256xf32, #tpu.memory_space<vmem>>, %arg9: memref<16x256xf32, #tpu.memory_space<vmem>>) attributes {dimension_semantics = [#tpu.dimension_semantics<parallel>], iteration_bounds = array<i64: 1>, scalar_prefetch = 0 : i64, scratch_operands = 0 : i64, tpu.core_type = #tpu.core_type<tc>, window_params = [{transform_indices = @transform_0, window_bounds = array<i64: 16, 256>}, {pipeline_mode = #tpu.pipeline_mode<synchronous>, transform_indices = @transform_1, window_bounds = array<i64: 256, 4>}, {pipeline_mode = #tpu.pipeline_mode<synchronous>, transform_indices = @transform_2, window_bounds = array<i64: 1, 4>}, {pipeline_mode = #tpu.pipeline_mode<synchronous>, transform_indices = @transform_3, window_bounds = array<i64: 4, 512>}, {pipeline_mode = #tpu.pipeline_mode<synchronous>, transform_indices = @transform_4, window_bounds = array<i64: 256, 512>}, {pipeline_mode = #tpu.pipeline_mode<synchronous>, transform_indices = @transform_5, window_bounds = array<i64: 1, 512>}, {pipeline_mode = #tpu.pipeline_mode<synchronous>, transform_indices = @transform_6, window_bounds = array<i64: 512, 256>}, {pipeline_mode = #tpu.pipeline_mode<synchronous>, transform_indices = @transform_7, window_bounds = array<i64: 4, 256>}, {transform_indices = @transform_8, window_bounds = array<i64: 16, 256>}]} {
    %c0 = arith.constant 0 : index
    %c0_0 = arith.constant 0 : index
    %0 = vector.load %arg1[%c0, %c0_0] : memref<16x256xf32, #tpu.memory_space<vmem>>, vector<16x256xf32>
    %c0_1 = arith.constant 0 : index
    %c0_2 = arith.constant 0 : index
    %1 = vector.load %arg2[%c0_1, %c0_2] : memref<256x4xf32, #tpu.memory_space<vmem>>, vector<256x4xf32>
    %cst = arith.constant dense<0.000000e+00> : vector<16x4xf32>
    %2 = tpu.matmul %0, %1, %cst {dimension_numbers = #tpu.dot_dimension_numbers<[1], [0], [0], [1], [0, 0, 1, 1], [], []>} : vector<16x256xf32>, vector<256x4xf32>, vector<16x4xf32> -> vector<16x4xf32>
    %c0_3 = arith.constant 0 : index
    %c0_4 = arith.constant 0 : index
    %3 = vector.load %arg3[%c0_3, %c0_4] : memref<1x4xf32, #tpu.memory_space<vmem>>, vector<1x4xf32>
    %4 = vector.broadcast %3 : vector<1x4xf32> to vector<16x4xf32>
    %5 = arith.addf %2, %4 : vector<16x4xf32>
    %cst_5 = arith.constant dense<0xFF800000> : vector<16xf32>
    %6 = vector.multi_reduction <maximumf>, %5, %cst_5 [1] : vector<16x4xf32> to vector<16xf32>
    %7 = vector.shape_cast %6 : vector<16xf32> to vector<16x1xf32>
    %8 = vector.broadcast %7 : vector<16x1xf32> to vector<16x4xf32>
    %9 = arith.subf %5, %8 : vector<16x4xf32>
    %10 = math.exp %9 : vector<16x4xf32>
    %cst_6 = arith.constant dense<0.000000e+00> : vector<16xf32>
    %11 = vector.multi_reduction <add>, %10, %cst_6 [1] : vector<16x4xf32> to vector<16xf32>
    %12 = vector.shape_cast %11 : vector<16xf32> to vector<16x1xf32>
    %13 = tpu.reciprocal %12 {approx = true} : vector<16x1xf32> -> vector<16x1xf32>
    %14 = vector.broadcast %13 : vector<16x1xf32> to vector<16x4xf32>
    %15 = arith.mulf %10, %14 : vector<16x4xf32>
    %c0_7 = arith.constant 0 : index
    %c0_8 = arith.constant 0 : index
    %16 = vector.load %arg4[%c0_7, %c0_8] : memref<4x512xf32, #tpu.memory_space<vmem>>, vector<4x512xf32>
    %cst_9 = arith.constant dense<0.000000e+00> : vector<16x512xf32>
    %17 = tpu.matmul %15, %16, %cst_9 {dimension_numbers = #tpu.dot_dimension_numbers<[1], [0], [0], [1], [0, 0, 1, 1], [], []>} : vector<16x4xf32>, vector<4x512xf32>, vector<16x512xf32> -> vector<16x512xf32>
    %c0_10 = arith.constant 0 : index
    %c0_11 = arith.constant 0 : index
    %18 = vector.load %arg5[%c0_10, %c0_11] : memref<256x512xf32, #tpu.memory_space<vmem>>, vector<256x512xf32>
    %cst_12 = arith.constant dense<0.000000e+00> : vector<16x512xf32>
    %19 = tpu.matmul %0, %18, %cst_12 {dimension_numbers = #tpu.dot_dimension_numbers<[1], [0], [0], [1], [0, 0, 1, 1], [], []>} : vector<16x256xf32>, vector<256x512xf32>, vector<16x512xf32> -> vector<16x512xf32>
    %c0_13 = arith.constant 0 : index
    %c0_14 = arith.constant 0 : index
    %20 = vector.load %arg6[%c0_13, %c0_14] : memref<1x512xf32, #tpu.memory_space<vmem>>, vector<1x512xf32>
    %21 = vector.broadcast %20 : vector<1x512xf32> to vector<16x512xf32>
    %22 = arith.addf %19, %21 : vector<16x512xf32>
    %cst_15 = arith.constant 0.000000e+00 : f32
    %23 = vector.broadcast %cst_15 : f32 to vector<16x512xf32>
    %24 = arith.maximumf %22, %23 : vector<16x512xf32>
    %25 = arith.mulf %24, %17 : vector<16x512xf32>
    %c0_16 = arith.constant 0 : index
    %c0_17 = arith.constant 0 : index
    %26 = vector.load %arg7[%c0_16, %c0_17] : memref<512x256xf32, #tpu.memory_space<vmem>>, vector<512x256xf32>
    %cst_18 = arith.constant dense<0.000000e+00> : vector<16x256xf32>
    %27 = tpu.matmul %25, %26, %cst_18 {dimension_numbers = #tpu.dot_dimension_numbers<[1], [0], [0], [1], [0, 0, 1, 1], [], []>} : vector<16x512xf32>, vector<512x256xf32>, vector<16x256xf32> -> vector<16x256xf32>
    %c0_19 = arith.constant 0 : index
    %c0_20 = arith.constant 0 : index
    %28 = vector.load %arg8[%c0_19, %c0_20] : memref<4x256xf32, #tpu.memory_space<vmem>>, vector<4x256xf32>
    %cst_21 = arith.constant dense<0.000000e+00> : vector<16x256xf32>
    %29 = tpu.matmul %15, %28, %cst_21 {dimension_numbers = #tpu.dot_dimension_numbers<[1], [0], [0], [1], [0, 0, 1, 1], [], []>} : vector<16x4xf32>, vector<4x256xf32>, vector<16x256xf32> -> vector<16x256xf32>
    %30 = arith.addf %27, %29 : vector<16x256xf32>
    %c0_22 = arith.constant 0 : index
    %c0_23 = arith.constant 0 : index
    %31 = vector.load %arg9[%c0_22, %c0_23] : memref<16x256xf32, #tpu.memory_space<vmem>>, vector<16x256xf32>
    tpu.vector_store %arg9[%c0_22, %c0_23], %30 {strides = array<i32>} : memref<16x256xf32, #tpu.memory_space<vmem>>, vector<16x256xf32>,
    return
  }
  func.func @transform_0(%arg0: i32) -> (i32, i32) {
    %c0_i32 = arith.constant 0 : i32
    %c0_i32_0 = arith.constant 0 : i32
    return %arg0, %c0_i32 : i32, i32
  }
  func.func @transform_1(%arg0: i32) -> (i32, i32) {
    %c0_i32 = arith.constant 0 : i32
    %c0_i32_0 = arith.constant 0 : i32
    %c0_i32_1 = arith.constant 0 : i32
    return %c0_i32, %c0_i32_0 : i32, i32
  }
  func.func @transform_2(%arg0: i32) -> (i32, i32) {
    %c0_i32 = arith.constant 0 : i32
    %c0_i32_0 = arith.constant 0 : i32
    %c0_i32_1 = arith.constant 0 : i32
    return %c0_i32, %c0_i32_0 : i32, i32
  }
  func.func @transform_3(%arg0: i32) -> (i32, i32) {
    %c0_i32 = arith.constant 0 : i32
    %c0_i32_0 = arith.constant 0 : i32
    %c0_i32_1 = arith.constant 0 : i32
    return %c0_i32, %c0_i32_0 : i32, i32
  }
  func.func @transform_4(%arg0: i32) -> (i32, i32) {
    %c0_i32 = arith.constant 0 : i32
    %c0_i32_0 = arith.constant 0 : i32
    %c0_i32_1 = arith.constant 0 : i32
    return %c0_i32, %c0_i32_0 : i32, i32
  }
  func.func @transform_5(%arg0: i32) -> (i32, i32) {
    %c0_i32 = arith.constant 0 : i32
    %c0_i32_0 = arith.constant 0 : i32
    %c0_i32_1 = arith.constant 0 : i32
    return %c0_i32, %c0_i32_0 : i32, i32
  }
  func.func @transform_6(%arg0: i32) -> (i32, i32) {
    %c0_i32 = arith.constant 0 : i32
    %c0_i32_0 = arith.constant 0 : i32
    %c0_i32_1 = arith.constant 0 : i32
    return %c0_i32, %c0_i32_0 : i32, i32
  }
  func.func @transform_7(%arg0: i32) -> (i32, i32) {
    %c0_i32 = arith.constant 0 : i32
    %c0_i32_0 = arith.constant 0 : i32
    %c0_i32_1 = arith.constant 0 : i32
    return %c0_i32, %c0_i32_0 : i32, i32
  }
  func.func @transform_8(%arg0: i32) -> (i32, i32) {
    %c0_i32 = arith.constant 0 : i32
    %c0_i32_0 = arith.constant 0 : i32
    return %arg0, %c0_i32 : i32, i32
  }
}

</mosaic_0001>

<bundles_post_ra>
// kernel: moe_forward.1
= control target key start
LH: loop header
LB: loop body
LE: loop exit
PB: predicated region body
PF: predicated region fallthrough
CT: control target
= control target key end

     0   :  { %s2449_s0 = inlined_call_operand.vmem [shape: f32[16,256], index: 0, kind: input, shape index: {}]   ;;  %s2450_s1 = inlined_call_operand.vmem [shape: f32[256,4], index: 1, kind: input, shape index: {}]   ;;  %s2451_s2 = inlined_call_operand.vmem [shape: f32[1,4], index: 2, kind: input, shape index: {}]   ;;  %s2452_s3 = inlined_call_operand.vmem [shape: f32[4,512], index: 3, kind: input, shape index: {}]   ;;  %s2453_s4 = inlined_call_operand.vmem [shape: f32[256,512], index: 4, kind: input, shape index: {}]   ;;  %s2454_s5 = inlined_call_operand.vmem [shape: f32[1,512], index: 5, kind: input, shape index: {}]   ;;  %s2455_s6 = inlined_call_operand.vmem [shape: f32[512,256], index: 6, kind: input, shape index: {}]   ;;  %s2456_s7 = inlined_call_operand.vmem [shape: f32[4,256], index: 7, kind: input, shape index: {}]   ;;  %s2457_s8 = inlined_call_operand.hbm [shape: f32[16,256], index: 8, kind: output, shape index: {}]  }
   0x1   :  { %v50_v0 = vld [vmem:[%s2450_s1 + $0x80] sm:$0xff]  ;;  %v51_v1 = vld [vmem:[%s2450_s1 + $0x88] sm:$0xff]  ;;  %v52_v5 = vld [vmem:[%s2450_s1 + $0x90] sm:$0xff] }
   0x2   :  { %v34_v2 = vld [vmem:[%s2450_s1] sm:$0xff]  ;;  %v1103_v3 = vpack.c.bf16 %v51_v1, %v50_v0  ;;  %v35_v4 = vld [vmem:[%s2450_s1 + $0x8] sm:$0xff]  ;;  %v53_v6 = vld [vmem:[%s2450_s1 + $0x98] sm:$0xff] }
   0x3   :  { %v1105_v7 = vpack.c.bf16 %v35_v4, %v34_v2  ;;  %v1107_v8 = vpack.c.bf16 %v53_v6, %v52_v5  ;;  %v36_v9 = vld [vmem:[%s2450_s1 + $0x10] sm:$0xff]  ;;  %v37_v10 = vld [vmem:[%s2450_s1 + $0x18] sm:$0xff]  ;;  %v54_v11 = vld [vmem:[%s2450_s1 + $0xa0] sm:$0xff] }
   0x4   :  { %1104 = vmatprep.subr.bf16.mxu0 %v1103_v3  ;;  %v55_v12 = vld [vmem:[%s2450_s1 + $0xa8] sm:$0xff]  ;;  %v1109_v13 = vpack.c.bf16 %v37_v10, %v36_v9  ;;  %v38_v15 = vld [vmem:[%s2450_s1 + $0x20] sm:$0xff]  ;;  %v56_v17 = vld [vmem:[%s2450_s1 + $0xb0] sm:$0xff] }
   0x5   :  { %1106 = vmatpush3.bf16.msra.mxu0 %v1105_v7  ;;  %v1111_v14 = vpack.c.bf16 %v55_v12, %v54_v11  ;;  %v39_v16 = vld [vmem:[%s2450_s1 + $0x28] sm:$0xff]  ;;  %v57_v18 = vld [vmem:[%s2450_s1 + $0xb8] sm:$0xff]  ;;  %v40_v21 = vld [vmem:[%s2450_s1 + $0x30] sm:$0xff] }
   0x6   :  { %1108 = vmatprep.subr.bf16.mxu0 %v1107_v8  ;;  %v1113_v19 = vpack.c.bf16 %v39_v16, %v38_v15  ;;  %v1115_v20 = vpack.c.bf16 %v57_v18, %v56_v17  ;;  %v41_v22 = vld [vmem:[%s2450_s1 + $0x38] sm:$0xff]  ;;  %v58_v23 = vld [vmem:[%s2450_s1 + $0xc0] sm:$0xff]  ;;  %v59_v24 = vld [vmem:[%s2450_s1 + $0xc8] sm:$0xff] }
   0x7   :  { %v1544_v25 = vld [vmem:[%s2449_s0 + $0x8] sm:$0xff]  ;;  %v1117_v26 = vpack.c.bf16 %v41_v22, %v40_v21 }
   0x8   :  { %137 = vmatprep.mubr.f32.mxu0 %v1544_v25 }
   0x9   :  { %1110 = vmatpush3.bf16.msra.mxu0 %v1109_v13 }
   0xa   :  { %1112 = vmatprep.subr.bf16.mxu0 %v1111_v14 }
   0xd   :  { %1114 = vmatpush3.bf16.msra.mxu0 %v1113_v19 }
   0xe   :  { %13 = vsyncpa [#allocation3], 0  ;;  %1116 = vmatprep.subr.bf16.mxu0 %v1115_v20  ;;  %v1119_v27 = vpack.c.bf16 %v59_v24, %v58_v23  ;;  %v42_v28 = vld [vmem:[%s2450_s1 + $0x40] sm:$0xff]  ;;  %v43_v29 = vld [vmem:[%s2450_s1 + $0x48] sm:$0xff]  ;;  %vm148_vm0 = vcmask 31744   ;;  %vm183_vm1 = vcmask 1043456  }
   0xf   :  { %v60_v30 = vld [vmem:[%s2450_s1 + $0xd0] sm:$0xff]  ;;  %v61_v31 = vld [vmem:[%s2450_s1 + $0xd8] sm:$0xff]  ;;  %v1121_v32 = vpack.c.bf16 %v43_v29, %v42_v28  ;;  %v62_v36 = vld [vmem:[%s2450_s1 + $0xe0] sm:$0xff]  ;;  %s1439_s21 = smov [#allocation2]  }
  0x10   :  { %v1123_v33 = vpack.c.bf16 %v61_v31, %v60_v30  ;;  %v44_v34 = vld [vmem:[%s2450_s1 + $0x50] sm:$0xff]  ;;  %v45_v35 = vld [vmem:[%s2450_s1 + $0x58] sm:$0xff]  ;;  %v63_v37 = vld [vmem:[%s2450_s1 + $0xe8] sm:$0xff] }
  0x11   :  { %1118 = vmatpush3.bf16.msra.mxu0 %v1117_v26  ;;  %v1125_v38 = vpack.c.bf16 %v45_v35, %v44_v34  ;;  %v1127_v39 = vpack.c.bf16 %v63_v37, %v62_v36  ;;  %v46_v40 = vld [vmem:[%s2450_s1 + $0x60] sm:$0xff]  ;;  %v47_v41 = vld [vmem:[%s2450_s1 + $0x68] sm:$0xff]  ;;  %v64_v42 = vld [vmem:[%s2450_s1 + $0xf0] sm:$0xff] }
  0x12   :  { %1120 = vmatprep.subr.bf16.mxu0 %v1119_v27  ;;  %v65_v43 = vld [vmem:[%s2450_s1 + $0xf8] sm:$0xff]  ;;  %v1129_v44 = vpack.c.bf16 %v47_v41, %v46_v40  ;;  %v48_v46 = vld [vmem:[%s2450_s1 + $0x70] sm:$0xff]  ;;  %v1592_v49 = vld [vmem:[%s2449_s0] sm:$0xff] }
  0x13   :  { %v1131_v45 = vpack.c.bf16 %v65_v43, %v64_v42  ;;  %v49_v47 = vld [vmem:[%s2450_s1 + $0x78] sm:$0xff]  ;;  %v1604_v51 = vld [vmem:[%s2449_s0 + $0x10] sm:$0xff]  ;;  %v1052_v54 = vld [vmem:[%s2451_s2] ss:$0 sm:$0xff] }
  0x14   :  { %v1133_v48 = vpack.c.bf16 %v49_v47, %v48_v46  ;;  %v1597_v50 = vld [vmem:[%s2449_s0 + $0x18] sm:$0xff]  ;;  %v347_v63 = vld [vmem:[%s2453_s4 + $0x8] sm:$0xff]  ;;  %v346_v1 = vld [vmem:[%s2453_s4] sm:$0xff] }
  0x15   :  { %1122 = vmatpush3.bf16.msra.mxu0 %v1121_v32  ;;  %v351_v0 = vld [vmem:[%s2453_s4 + $0x28] sm:$0xff]  ;;  %v350_v3 = vld [vmem:[%s2453_s4 + $0x20] sm:$0xff] }
  0x16   :  { %1124 = vmatprep.subr.bf16.mxu0 %v1123_v33  ;;  %v1135_v2 = vpack.c.bf16 %v351_v0, %v347_v63  ;;  %v355_v4 = vld [vmem:[%s2453_s4 + $0x48] sm:$0xff]  ;;  %v1137_v6 = vpack.c.bf16 %v350_v3, %v346_v1  ;;  %v354_v8 = vld [vmem:[%s2453_s4 + $0x40] sm:$0xff] }
  0x17   :  { %v359_v5 = vld [vmem:[%s2453_s4 + $0x68] sm:$0xff]  ;;  %v358_v9 = vld [vmem:[%s2453_s4 + $0x60] sm:$0xff] }
  0x18   :  { %v1139_v7 = vpack.c.bf16 %v359_v5, %v355_v4  ;;  %v363_v10 = vld [vmem:[%s2453_s4 + $0x88] sm:$0xff]  ;;  %v1141_v12 = vpack.c.bf16 %v358_v9, %v354_v8  ;;  %v362_v14 = vld [vmem:[%s2453_s4 + $0x80] sm:$0xff] }
  0x19   :  { %1126 = vmatpush3.bf16.msra.mxu0 %v1125_v38  ;;  %v367_v11 = vld [vmem:[%s2453_s4 + $0xa8] sm:$0xff]  ;;  %v366_v15 = vld [vmem:[%s2453_s4 + $0xa0] sm:$0xff] }
  0x1a   :  { %1128 = vmatprep.subr.bf16.mxu0 %v1127_v39  ;;  %v1143_v13 = vpack.c.bf16 %v367_v11, %v363_v10  ;;  %v371_v16 = vld [vmem:[%s2453_s4 + $0xc8] sm:$0xff]  ;;  %v1145_v18 = vpack.c.bf16 %v366_v15, %v362_v14  ;;  %v370_v20 = vld [vmem:[%s2453_s4 + $0xc0] sm:$0xff] }
  0x1b   :  { %v375_v17 = vld [vmem:[%s2453_s4 + $0xe8] sm:$0xff]  ;;  %v374_v21 = vld [vmem:[%s2453_s4 + $0xe0] sm:$0xff] }
  0x1c   :  { %v1147_v19 = vpack.c.bf16 %v375_v17, %v371_v16  ;;  %v379_v22 = vld [vmem:[%s2453_s4 + $0x108] sm:$0xff]  ;;  %v1149_v24 = vpack.c.bf16 %v374_v21, %v370_v20  ;;  %v378_v27 = vld [vmem:[%s2453_s4 + $0x100] sm:$0xff] }
  0x1d   :  { %1130 = vmatpush3.bf16.msra.mxu0 %v1129_v44  ;;  %v383_v23 = vld [vmem:[%s2453_s4 + $0x128] sm:$0xff]  ;;  %v382_v28 = vld [vmem:[%s2453_s4 + $0x120] sm:$0xff] }
  0x1e   :  { %1132 = vmatprep.subr.bf16.mxu0 %v1131_v45  ;;  %v1151_v26 = vpack.c.bf16 %v383_v23, %v379_v22  ;;  %v387_v29 = vld [vmem:[%s2453_s4 + $0x148] sm:$0xff]  ;;  %v1153_v31 = vpack.c.bf16 %v382_v28, %v378_v27  ;;  %v386_v33 = vld [vmem:[%s2453_s4 + $0x140] sm:$0xff] }
  0x1f   :  { %v391_v30 = vld [vmem:[%s2453_s4 + $0x168] sm:$0xff]  ;;  %v390_v34 = vld [vmem:[%s2453_s4 + $0x160] sm:$0xff] }
  0x20   :  { %v1155_v32 = vpack.c.bf16 %v391_v30, %v387_v29  ;;  %v395_v35 = vld [vmem:[%s2453_s4 + $0x188] sm:$0xff]  ;;  %v1157_v37 = vpack.c.bf16 %v390_v34, %v386_v33  ;;  %v394_v39 = vld [vmem:[%s2453_s4 + $0x180] sm:$0xff] }
  0x21   :  { %1134 = vmatpush3.bf16.msra.mxu0 %v1133_v48  ;;  %v399_v36 = vld [vmem:[%s2453_s4 + $0x1a8] sm:$0xff]  ;;  %v398_v40 = vld [vmem:[%s2453_s4 + $0x1a0] sm:$0xff] }
  0x22   :  { %1136 = vmatprep.subr.bf16.mxu0 %v1135_v2  ;;  %v1159_v38 = vpack.c.bf16 %v399_v36, %v395_v35  ;;  %v403_v41 = vld [vmem:[%s2453_s4 + $0x1c8] sm:$0xff]  ;;  %v1161_v43 = vpack.c.bf16 %v398_v40, %v394_v39  ;;  %v402_v45 = vld [vmem:[%s2453_s4 + $0x1c0] sm:$0xff] }
  0x23   :  { %v407_v42 = vld [vmem:[%s2453_s4 + $0x1e8] sm:$0xff]  ;;  %v406_v46 = vld [vmem:[%s2453_s4 + $0x1e0] sm:$0xff] }
  0x24   :  { %138 = vmatmul.mubr.f32.vlgmr.msra.gmra.mrb[0].mxu0 %v1592_v49  ;;  %v1163_v44 = vpack.c.bf16 %v407_v42, %v403_v41  ;;  %v411_v47 = vld [vmem:[%s2453_s4 + $0x208] sm:$0xff]  ;;  %v422_v63 = vld [vmem:[%s2453_s4 + $0x260] sm:$0xff]  ;;  %v348_v41 = vld [vmem:[%s2453_s4 + $0x10] sm:$0xff] }
  0x25   :  { %142 = vmatprep.mubr.f32.mxu0 %v1597_v50  ;;  %1138 = vmatpush1.bf16.msra.mxu0 %v1137_v6  ;;  %v415_v48 = vld [vmem:[%s2453_s4 + $0x228] sm:$0xff]  ;;  %v426_v4 = vld [vmem:[%s2453_s4 + $0x280] sm:$0xff]  ;;  %v352_v42 = vld [vmem:[%s2453_s4 + $0x30] sm:$0xff] }
  0x26   :  { %1140 = vmatprep.subr.bf16.mxu0 %v1139_v7  ;;  %v427_v0 = vld [vmem:[%s2453_s4 + $0x288] sm:$0xff]  ;;  %v430_v5 = vld [vmem:[%s2453_s4 + $0x2a0] sm:$0xff] }
  0x27   :  { %v431_v1 = vld [vmem:[%s2453_s4 + $0x2a8] sm:$0xff]  ;;  %v1177_v8 = vpack.c.bf16 %v430_v5, %v426_v4  ;;  %v434_v10 = vld [vmem:[%s2453_s4 + $0x2c0] sm:$0xff]  ;;  %v380_v5 = vld [vmem:[%s2453_s4 + $0x110] sm:$0xff] }
  0x28   :  { %143 = vmatmul.mubr.f32.gmra.mrb[2].mxu0 %v1604_v51  ;;  %v1175_v3 = vpack.c.bf16 %v431_v1, %v427_v0  ;;  %v435_v6 = vld [vmem:[%s2453_s4 + $0x2c8] sm:$0xff]  ;;  %v438_v11 = vld [vmem:[%s2453_s4 + $0x2e0] sm:$0xff]  ;;  %v372_v0 = vld [vmem:[%s2453_s4 + $0xd0] sm:$0xff] }
  0x29   :  { %560 = vmatprep.mubr.f32.mxu0 %v1544_v25  ;;  %1142 = vmatpush1.bf16.msra.mxu0 %v1141_v12  ;;  %v439_v7 = vld [vmem:[%s2453_s4 + $0x2e8] sm:$0xff]  ;;  %v1181_v14 = vpack.c.bf16 %v438_v11, %v434_v10  ;;  %v442_v16 = vld [vmem:[%s2453_s4 + $0x300] sm:$0xff]  ;;  %v376_v1 = vld [vmem:[%s2453_s4 + $0xf0] sm:$0xff] }
  0x2a   :  { %1144 = vmatprep.subr.bf16.mxu0 %v1143_v13  ;;  %v1179_v9 = vpack.c.bf16 %v439_v7, %v435_v6  ;;  %v443_v12 = vld [vmem:[%s2453_s4 + $0x308] sm:$0xff]  ;;  %v446_v17 = vld [vmem:[%s2453_s4 + $0x320] sm:$0xff]  ;;  %v384_v6 = vld [vmem:[%s2453_s4 + $0x130] sm:$0xff] }
  0x2b   :  { %v447_v13 = vld [vmem:[%s2453_s4 + $0x328] sm:$0xff]  ;;  %v1185_v20 = vpack.c.bf16 %v446_v17, %v442_v16  ;;  %v450_v22 = vld [vmem:[%s2453_s4 + $0x340] sm:$0xff]  ;;  %v389_v7 = vld [vmem:[%s2453_s4 + $0x158] sm:$0xff] }
  0x2c   :  { %v1183_v15 = vpack.c.bf16 %v447_v13, %v443_v12  ;;  %v454_v23 = vld [vmem:[%s2453_s4 + $0x360] sm:$0xff]  ;;  %v388_v11 = vld [vmem:[%s2453_s4 + $0x150] sm:$0xff]  ;;  %v397_v13 = vld [vmem:[%s2453_s4 + $0x198] sm:$0xff] }
  0x2d   :  { %1146 = vmatpush1.bf16.msra.mxu0 %v1145_v18  ;;  %v451_v18 = vld [vmem:[%s2453_s4 + $0x348] sm:$0xff]  ;;  %v1189_v27 = vpack.c.bf16 %v454_v23, %v450_v22  ;;  %v458_v29 = vld [vmem:[%s2453_s4 + $0x380] sm:$0xff]  ;;  %v392_v12 = vld [vmem:[%s2453_s4 + $0x170] sm:$0xff] }
  0x2e   :  { %1148 = vmatprep.subr.bf16.mxu0 %v1147_v19  ;;  %v455_v19 = vld [vmem:[%s2453_s4 + $0x368] sm:$0xff]  ;;  %v462_v30 = vld [vmem:[%s2453_s4 + $0x3a0] sm:$0xff]  ;;  %v396_v17 = vld [vmem:[%s2453_s4 + $0x190] sm:$0xff] }
  0x2f   :  { %v1187_v21 = vpack.c.bf16 %v455_v19, %v451_v18  ;;  %v1193_v33 = vpack.c.bf16 %v462_v30, %v458_v29  ;;  %v466_v35 = vld [vmem:[%s2453_s4 + $0x3c0] sm:$0xff]  ;;  %v400_v18 = vld [vmem:[%s2453_s4 + $0x1b0] sm:$0xff]  ;;  %v405_v19 = vld [vmem:[%s2453_s4 + $0x1d8] sm:$0xff] }
  0x30   :  { %v470_v36 = vld [vmem:[%s2453_s4 + $0x3e0] sm:$0xff]  ;;  %v404_v23 = vld [vmem:[%s2453_s4 + $0x1d0] sm:$0xff] }
  0x31   :  { %1150 = vmatpush1.bf16.msra.mxu0 %v1149_v24  ;;  %v459_v24 = vld [vmem:[%s2453_s4 + $0x388] sm:$0xff]  ;;  %v1197_v39 = vpack.c.bf16 %v470_v36, %v466_v35  ;;  %v412_v30 = vld [vmem:[%s2453_s4 + $0x210] sm:$0xff] }
  0x32   :  { %1152 = vmatprep.subr.bf16.mxu0 %v1151_v26  ;;  %v463_v26 = vld [vmem:[%s2453_s4 + $0x3a8] sm:$0xff]  ;;  %v420_v36 = vld [vmem:[%s2453_s4 + $0x250] sm:$0xff] }
  0x33   :  { %v1191_v28 = vpack.c.bf16 %v463_v26, %v459_v24  ;;  %v408_v24 = vld [vmem:[%s2453_s4 + $0x1f0] sm:$0xff]  ;;  %v413_v26 = vld [vmem:[%s2453_s4 + $0x218] sm:$0xff] }
  0x35   :  { %1154 = vmatpush1.bf16.msra.mxu0 %v1153_v31  ;;  %v467_v31 = vld [vmem:[%s2453_s4 + $0x3c8] sm:$0xff] }
  0x36   :  { %1156 = vmatprep.subr.bf16.mxu0 %v1155_v32  ;;  %v471_v32 = vld [vmem:[%s2453_s4 + $0x3e8] sm:$0xff] }
  0x37   :  { %v1195_v34 = vpack.c.bf16 %v471_v32, %v467_v31  ;;  %v416_v31 = vld [vmem:[%s2453_s4 + $0x230] sm:$0xff]  ;;  %v421_v32 = vld [vmem:[%s2453_s4 + $0x258] sm:$0xff] }
  0x39   :  { %1158 = vmatpush1.bf16.msra.mxu0 %v1157_v37  ;;  %v349_v37 = vld [vmem:[%s2453_s4 + $0x18] sm:$0xff] }
  0x3a   :  { %1160 = vmatprep.subr.bf16.mxu0 %v1159_v38  ;;  %v353_v38 = vld [vmem:[%s2453_s4 + $0x38] sm:$0xff] }
  0x3b   :  { %v1199_v40 = vpack.c.bf16 %v353_v38, %v349_v37  ;;  %v424_v37 = vld [vmem:[%s2453_s4 + $0x270] sm:$0xff]  ;;  %v429_v38 = vld [vmem:[%s2453_s4 + $0x298] sm:$0xff] }
  0x3d   :  { %1162 = vmatpush1.bf16.msra.mxu0 %v1161_v43  ;;  %v357_v43 = vld [vmem:[%s2453_s4 + $0x58] sm:$0xff] }
  0x3e   :  { %1164 = vmatprep.subr.bf16.mxu0 %v1163_v44  ;;  %v361_v44 = vld [vmem:[%s2453_s4 + $0x78] sm:$0xff] }
  0xf7   :  { %v1097_v52 = vpop.f32.mrb[0].mxu0 }
  0xf8   :  { %v1098_v53 = vpop.f32.mrb[1].mxu0 }
  0xf9   :  { %v1099_v55 = vadd.f32 %v1098_v53, %v1097_v52  ;;  %v1165_v52 = vpack.c.bf16 %v406_v46, %v402_v45  ;;  %v1167_v53 = vpack.c.bf16 %v415_v48, %v411_v47  ;;  %v1201_v45 = vpack.c.bf16 %v352_v42, %v348_v41  ;;  %v356_v47 = vld [vmem:[%s2453_s4 + $0x50] sm:$0xff] }
  0xfa   :  { %v1203_v46 = vpack.c.bf16 %v361_v44, %v357_v43  ;;  %v360_v48 = vld [vmem:[%s2453_s4 + $0x70] sm:$0xff]  ;;  %v437_v44 = vld [vmem:[%s2453_s4 + $0x2d8] sm:$0xff] }
  0xfb   :  { %v1100_v56 = vpop.f32.mrb[2].mxu0  ;;  %v1611_v57 = vadd.f32 %v1099_v55, %v1052_v54  ;;  %v414_v55 = vld [vmem:[%s2453_s4 + $0x220] sm:$0xff]  ;;  %1166 = vmatpush1.bf16.msra.mxu0 %v1165_v52  ;;  %v365_v52 = vld [vmem:[%s2453_s4 + $0x98] sm:$0xff]  ;;  %v428_v42 = vld [vmem:[%s2453_s4 + $0x290] sm:$0xff] }
  0xfc   :  { %v1101_v58 = vpop.f32.mrb[3].mxu0  ;;  %1168 = vmatprep.subr.bf16.mxu0 %v1167_v53  ;;  %v369_v53 = vld [vmem:[%s2453_s4 + $0xb8] sm:$0xff]  ;;  %v432_v43 = vld [vmem:[%s2453_s4 + $0x2b0] sm:$0xff] }
  0xfd   :  { %v1102_v59 = vadd.f32 %v1101_v58, %v1100_v56  ;;  %v149_v60 = vsel %vm148_vm0, %v1611_v57, -inf  ;;  %v419_v56 = vld [vmem:[%s2453_s4 + $0x248] sm:$0xff] }
  0xfe   :  { %150 = vmax.xlane.f32.xlu0 %v149_v60  ;;  %v423_v58 = vld [vmem:[%s2453_s4 + $0x268] sm:$0xff] }
  0xff   :  { %v1615_v61 = vadd.f32 %v1102_v59, %v1052_v54  ;;  %v410_v54 = vld [vmem:[%s2453_s4 + $0x200] sm:$0xff]  ;;  %v1171_v60 = vpack.c.bf16 %v423_v58, %v419_v56  ;;  %v364_v56 = vld [vmem:[%s2453_s4 + $0x90] sm:$0xff] }
 0x100   :  { %v1169_v59 = vpack.c.bf16 %v414_v55, %v410_v54  ;;  %v1205_v54 = vpack.c.bf16 %v360_v48, %v356_v47  ;;  %v1207_v55 = vpack.c.bf16 %v369_v53, %v365_v52  ;;  %v368_v58 = vld [vmem:[%s2453_s4 + $0xb0] sm:$0xff] }
 0x101   :  { %v152_v62 = vsel %vm148_vm0, %v1615_v61, -inf  ;;  %v436_v48 = vld [vmem:[%s2453_s4 + $0x2d0] sm:$0xff] }
 0x102   :  { %153 = vmax.xlane.f32.xlu0 %v152_v62  ;;  %v418_v62 = vld [vmem:[%s2453_s4 + $0x240] sm:$0xff]  ;;  %1170 = vmatpush1.bf16.msra.mxu0 %v1169_v59  ;;  %v373_v59 = vld [vmem:[%s2453_s4 + $0xd8] sm:$0xff]  ;;  %v440_v52 = vld [vmem:[%s2453_s4 + $0x2f0] sm:$0xff] }
 0x103   :  { %v1173_v2 = vpack.c.bf16 %v422_v63, %v418_v62  ;;  %1172 = vmatprep.subr.bf16.mxu0 %v1171_v60  ;;  %v377_v60 = vld [vmem:[%s2453_s4 + $0xf8] sm:$0xff]  ;;  %v1209_v62 = vpack.c.bf16 %v368_v58, %v364_v56 }
 0x104   :  { %v1211_v63 = vpack.c.bf16 %v377_v60, %v373_v59 }
 0x106   :  { %1174 = vmatpush1.bf16.msra.mxu0 %v1173_v2  ;;  %v381_v2 = vld [vmem:[%s2453_s4 + $0x118] sm:$0xff] }
 0x107   :  { %1176 = vmatprep.subr.bf16.mxu0 %v1175_v3  ;;  %v385_v3 = vld [vmem:[%s2453_s4 + $0x138] sm:$0xff] }
 0x108   :  { %v1215_v4 = vpack.c.bf16 %v385_v3, %v381_v2  ;;  %v449_v2 = vld [vmem:[%s2453_s4 + $0x338] sm:$0xff]  ;;  %v444_v3 = vld [vmem:[%s2453_s4 + $0x310] sm:$0xff] }
 0x10a   :  { %1178 = vmatpush1.bf16.msra.mxu0 %v1177_v8  ;;  %v393_v8 = vld [vmem:[%s2453_s4 + $0x178] sm:$0xff] }
 0x10b   :  { %1180 = vmatprep.subr.bf16.mxu0 %v1179_v9  ;;  %v1217_v9 = vpack.c.bf16 %v384_v6, %v380_v5  ;;  %v1219_v10 = vpack.c.bf16 %v393_v8, %v389_v7  ;;  %v453_v5 = vld [vmem:[%s2453_s4 + $0x358] sm:$0xff]  ;;  %v452_v8 = vld [vmem:[%s2453_s4 + $0x350] sm:$0xff] }
 0x10c   :  { %v457_v6 = vld [vmem:[%s2453_s4 + $0x378] sm:$0xff] }
 0x10d   :  { %v1251_v7 = vpack.c.bf16 %v457_v6, %v453_v5 }
 0x10e   :  { %1182 = vmatpush1.bf16.msra.mxu0 %v1181_v14  ;;  %v401_v14 = vld [vmem:[%s2453_s4 + $0x1b8] sm:$0xff] }
 0x10f   :  { %1184 = vmatprep.subr.bf16.mxu0 %v1183_v15  ;;  %v1221_v15 = vpack.c.bf16 %v392_v12, %v388_v11  ;;  %v1223_v16 = vpack.c.bf16 %v401_v14, %v397_v13  ;;  %v461_v11 = vld [vmem:[%s2453_s4 + $0x398] sm:$0xff]  ;;  %v460_v13 = vld [vmem:[%s2453_s4 + $0x390] sm:$0xff] }
 0x110   :  { %v465_v12 = vld [vmem:[%s2453_s4 + $0x3b8] sm:$0xff] }
 0x111   :  { %v1255_v14 = vpack.c.bf16 %v465_v12, %v461_v11 }
 0x112   :  { %1186 = vmatpush1.bf16.msra.mxu0 %v1185_v20  ;;  %v409_v20 = vld [vmem:[%s2453_s4 + $0x1f8] sm:$0xff] }
 0x113   :  { %1188 = vmatprep.subr.bf16.mxu0 %v1187_v21  ;;  %v1225_v21 = vpack.c.bf16 %v400_v18, %v396_v17  ;;  %v1227_v22 = vpack.c.bf16 %v409_v20, %v405_v19  ;;  %v1438_v17 = vmov 0.0   ;;  %v469_v20 = vld [vmem:[%s2453_s4 + $0x3d8] sm:$0xff] }
 0x114   :  { %256 = vmatprep.mubr.f32.mxu1 %v1438_v17 }
 0x116   :  { %1190 = vmatpush1.bf16.msra.mxu0 %v1189_v27  ;;  %v417_v27 = vld [vmem:[%s2453_s4 + $0x238] sm:$0xff] }
 0x117   :  { %1192 = vmatprep.subr.bf16.mxu0 %v1191_v28  ;;  %v1229_v28 = vpack.c.bf16 %v408_v24, %v404_v23  ;;  %v1231_v29 = vpack.c.bf16 %v417_v27, %v413_v26  ;;  %v468_v23 = vld [vmem:[%s2453_s4 + $0x3d0] sm:$0xff]  ;;  %v172_v27 = vld [vmem:[%s2452_s3 + $0x8] sm:$0xff] }
 0x118   :  { %v472_v24 = vld [vmem:[%s2453_s4 + $0x3f0] sm:$0xff] }
 0x119   :  { %v1261_v26 = vpack.c.bf16 %v472_v24, %v468_v23 }
 0x11a   :  { %1194 = vmatpush1.bf16.msra.mxu0 %v1193_v33  ;;  %v425_v33 = vld [vmem:[%s2453_s4 + $0x278] sm:$0xff] }
 0x11b   :  { %1196 = vmatprep.subr.bf16.mxu0 %v1195_v34  ;;  %v1233_v34 = vpack.c.bf16 %v416_v31, %v412_v30  ;;  %v1235_v35 = vpack.c.bf16 %v425_v33, %v421_v32  ;;  %v794_v31 = vld [vmem:[%s2456_s7] sm:$0xff]  ;;  %s1041_s7 = sshll.u32 %s1439_s21, 4  ;;  %s1042_s7 = int_to_ptr.vmem [resolvable:$true] %s1041_s7 }
 0x11c   :  { %p1419_p1 = scmp.lt.s32.totalorder %s1042_s7, %s1042_s7 }
 0x11e   :  { %1198 = vmatpush1.bf16.msra.mxu0 %v1197_v39  ;;  %v433_v39 = vld [vmem:[%s2453_s4 + $0x2b8] sm:$0xff] }
 0x11f   :  { %1200 = vmatprep.subr.bf16.mxu0 %v1199_v40  ;;  %v1237_v40 = vpack.c.bf16 %v424_v37, %v420_v36  ;;  %v1239_v41 = vpack.c.bf16 %v433_v39, %v429_v38  ;;  %v667_v36 = vld [vmem:[%s2455_s6 + $0x8] sm:$0xff]  ;;  %v669_v37 = vld [vmem:[%s2455_s6 + $0x18] sm:$0xff]  ;;  %v666_v39 = vld [vmem:[%s2455_s6] sm:$0xff] }
 0x120   :  { %v1263_v38 = vpack.c.bf16 %v669_v37, %v667_v36  ;;  %v706_v37 = vld [vmem:[%s2455_s6 + $0x140] sm:$0xff] }
 0x121   :  { %561 = vmatmul.mubr.f32.vlgmr.msra.gmra.mrb[4].mxu0 %v1592_v49 }
 0x122   :  { %1202 = vmatpush1.bf16.msra.mxu0 %v1201_v45  ;;  %566 = vmatprep.mubr.f32.mxu0 %v1597_v50  ;;  %v441_v45 = vld [vmem:[%s2453_s4 + $0x2f8] sm:$0xff] }
 0x123   :  { %1204 = vmatprep.subr.bf16.mxu0 %v1203_v46  ;;  %v1241_v46 = vpack.c.bf16 %v432_v43, %v428_v42  ;;  %v1243_v47 = vpack.c.bf16 %v441_v45, %v437_v44  ;;  %v673_v42 = vld [vmem:[%s2455_s6 + $0x38] sm:$0xff]  ;;  %v670_v45 = vld [vmem:[%s2455_s6 + $0x20] sm:$0xff] }
 0x125   :  { %567 = vmatmul.mubr.f32.gmra.mrb[6].mxu0 %v1604_v51 }
 0x126   :  { %1206 = vmatpush1.bf16.msra.mxu0 %v1205_v54  ;;  %637 = vmatprep.mubr.f32.mxu0 %v1544_v25  ;;  %v1213_v25 = vpack.c.bf16 %v376_v1, %v372_v0 }
 0x127   :  { %1208 = vmatprep.subr.bf16.mxu0 %v1207_v55  ;;  %v1245_v55 = vpack.c.bf16 %v440_v52, %v436_v48  ;;  %v677_v48 = vld [vmem:[%s2455_s6 + $0x58] sm:$0xff] }
 0x12a   :  { %1210 = vmatpush1.bf16.msra.mxu0 %v1209_v62 }
 0x12b   :  { %1212 = vmatprep.subr.bf16.mxu0 %v1211_v63 }
 0x12e   :  { %1214 = vmatpush1.bf16.msra.mxu0 %v1213_v25  ;;  %v448_v25 = vld [vmem:[%s2453_s4 + $0x330] sm:$0xff] }
 0x12f   :  { %1216 = vmatprep.subr.bf16.mxu0 %v1215_v4  ;;  %v1249_v4 = vpack.c.bf16 %v448_v25, %v444_v3  ;;  %v684_v3 = vld [vmem:[%s2455_s6 + $0x90] sm:$0xff]  ;;  %v687_v25 = vld [vmem:[%s2455_s6 + $0xa8] sm:$0xff] }
 0x132   :  { %1218 = vmatpush1.bf16.msra.mxu0 %v1217_v9  ;;  %v456_v9 = vld [vmem:[%s2453_s4 + $0x370] sm:$0xff] }
 0x133   :  { %1220 = vmatprep.subr.bf16.mxu0 %v1219_v10  ;;  %v1253_v10 = vpack.c.bf16 %v456_v9, %v452_v8  ;;  %v688_v8 = vld [vmem:[%s2455_s6 + $0xb0] sm:$0xff]  ;;  %v691_v9 = vld [vmem:[%s2455_s6 + $0xc8] sm:$0xff] }
 0x136   :  { %1222 = vmatpush1.bf16.msra.mxu0 %v1221_v15  ;;  %v464_v15 = vld [vmem:[%s2453_s4 + $0x3b0] sm:$0xff] }
 0x137   :  { %1224 = vmatprep.subr.bf16.mxu0 %v1223_v16  ;;  %v171_v16 = vld [vmem:[%s2452_s3] sm:$0xff]  ;;  %v1257_v18 = vpack.c.bf16 %v464_v15, %v460_v13  ;;  %v695_v15 = vld [vmem:[%s2455_s6 + $0xe8] sm:$0xff] }
 0x138   :  { %v175_v19 = vcombine.high %v171_v16, %v171_v16  ;;  %v690_v13 = vld [vmem:[%s2455_s6 + $0xc0] sm:$0xff] }
 0x13a   :  { %1226 = vmatpush1.bf16.msra.mxu0 %v1225_v21  ;;  %1053 = vmatprep.subr.msk.mxu1 %vm183_vm1, %v175_v19  ;;  %v473_v21 = vld [vmem:[%s2453_s4 + $0x3f8] sm:$0xff]  ;;  %v694_v19 = vld [vmem:[%s2455_s6 + $0xe0] sm:$0xff] }
 0x13b   :  { %1228 = vmatprep.subr.bf16.mxu0 %v1227_v22  ;;  %1054 = vmatpush1.msk.msra.mxu1 %vm183_vm1, %v171_v16  ;;  %v1259_v22 = vpack.c.bf16 %v473_v21, %v469_v20  ;;  %v697_v16 = vld [vmem:[%s2455_s6 + $0xf8] sm:$0xff]  ;;  %v696_v20 = vld [vmem:[%s2455_s6 + $0xf0] sm:$0xff]  ;;  %v699_v21 = vld [vmem:[%s2455_s6 + $0x108] sm:$0xff] }
 0x13c   :  { %v1293_v23 = vpack.c.bf16 %v696_v20, %v694_v19  ;;  %v474_v20 = vld [vmem:[%s2454_s5] sm:$0xf] }
 0x13e   :  { %1230 = vmatpush1.bf16.msra.mxu0 %v1229_v28  ;;  %v176_v28 = vcombine.high %v172_v27, %v172_v27 }
 0x13f   :  { %1232 = vmatprep.subr.bf16.mxu0 %v1231_v29 }
 0x140   :  { %1057 = vmatprep.subr.msk.mxu1 %vm183_vm1, %v176_v28  ;;  %v703_v28 = vld [vmem:[%s2455_s6 + $0x128] sm:$0xff] }
 0x142   :  { %1234 = vmatpush1.bf16.msra.mxu0 %v1233_v34  ;;  %v796_v34 = vcombine.high %v794_v31, %v794_v31 }
 0x143   :  { %1236 = vmatprep.subr.bf16.mxu0 %v1235_v35 }
 0x146   :  { %1238 = vmatpush1.bf16.msra.mxu0 %v1237_v40  ;;  %v668_v40 = vld [vmem:[%s2455_s6 + $0x10] sm:$0xff] }
 0x147   :  { %1240 = vmatprep.subr.bf16.mxu0 %v1239_v41  ;;  %v671_v41 = vld [vmem:[%s2455_s6 + $0x28] sm:$0xff]  ;;  %v1265_v43 = vpack.c.bf16 %v668_v40, %v666_v39  ;;  %v713_v40 = vld [vmem:[%s2455_s6 + $0x178] sm:$0xff] }
 0x148   :  { %v1267_v44 = vpack.c.bf16 %v673_v42, %v671_v41  ;;  %v711_v39 = vld [vmem:[%s2455_s6 + $0x168] sm:$0xff] }
 0x149   :  { %v1307_v42 = vpack.c.bf16 %v713_v40, %v711_v39 }
 0x14a   :  { %1242 = vmatpush1.bf16.msra.mxu0 %v1241_v46  ;;  %v672_v46 = vld [vmem:[%s2455_s6 + $0x30] sm:$0xff] }
 0x14b   :  { %1244 = vmatprep.subr.bf16.mxu0 %v1243_v47  ;;  %v675_v47 = vld [vmem:[%s2455_s6 + $0x48] sm:$0xff]  ;;  %v1269_v52 = vpack.c.bf16 %v672_v46, %v670_v45  ;;  %v717_v46 = vld [vmem:[%s2455_s6 + $0x198] sm:$0xff] }
 0x14c   :  { %v715_v45 = vld [vmem:[%s2455_s6 + $0x188] sm:$0xff] }
 0x14e   :  { %1246 = vmatpush1.bf16.msra.mxu0 %v1245_v55  ;;  %v676_v55 = vld [vmem:[%s2455_s6 + $0x50] sm:$0xff] }
 0x18b   :  { %v151_v53 = vpop.xlane.xlu0 %150 }
 0x18c   :  { %v155_v54 = vsub.f32 %v1611_v57, %v151_v53  ;;  %v445_v57 = vld [vmem:[%s2453_s4 + $0x318] sm:$0xff]  ;;  %v1271_v53 = vpack.c.bf16 %v677_v48, %v675_v47  ;;  %v1311_v48 = vpack.c.bf16 %v717_v46, %v715_v45  ;;  %v734_v46 = vld [vmem:[%s2455_s6 + $0x220] sm:$0xff] }
 0x18e   :  { %v157_v56 = vmul.f32 1.442695, %v155_v54  ;;  %v674_v54 = vld [vmem:[%s2455_s6 + $0x40] sm:$0xff] }
 0x18f   :  { %v154_v58 = vpop.xlane.xlu0 %153 }
 0x190   :  { %1406 = vpow2.f32 %v157_v56  ;;  %v156_v59 = vsub.f32 %v1615_v61, %v154_v58  ;;  %v1247_v61 = vpack.c.bf16 %v449_v2, %v445_v57  ;;  %v679_v56 = vld [vmem:[%s2455_s6 + $0x68] sm:$0xff]  ;;  %v681_v58 = vld [vmem:[%s2455_s6 + $0x78] sm:$0xff] }
 0x192   :  { %v159_v60 = vmul.f32 1.442695, %v156_v59  ;;  %1248 = vmatprep.subr.bf16.mxu0 %v1247_v61  ;;  %v1273_v59 = vpack.c.bf16 %v676_v55, %v674_v54  ;;  %v682_v61 = vld [vmem:[%s2455_s6 + $0x80] sm:$0xff]  ;;  %v719_v54 = vld [vmem:[%s2455_s6 + $0x1a8] sm:$0xff]  ;;  %v721_v55 = vld [vmem:[%s2455_s6 + $0x1b8] sm:$0xff] }
 0x193   :  { %1250 = vmatpush1.bf16.msra.mxu0 %v1249_v4  ;;  %v689_v4 = vld [vmem:[%s2455_s6 + $0xb8] sm:$0xff]  ;;  %v1281_v5 = vpack.c.bf16 %v684_v3, %v682_v61  ;;  %v727_v3 = vld [vmem:[%s2455_s6 + $0x1e8] sm:$0xff] }
 0x194   :  { %1408 = vpow2.f32 %v159_v60  ;;  %1252 = vmatprep.subr.bf16.mxu0 %v1251_v7  ;;  %v1275_v60 = vpack.c.bf16 %v681_v58, %v679_v56  ;;  %v1283_v6 = vpack.c.bf16 %v689_v4, %v687_v25  ;;  %v686_v7 = vld [vmem:[%s2455_s6 + $0xa0] sm:$0xff]  ;;  %v1315_v58 = vpack.c.bf16 %v721_v55, %v719_v54  ;;  %v729_v25 = vld [vmem:[%s2455_s6 + $0x1f8] sm:$0xff] }
 0x195   :  { %v1285_v11 = vpack.c.bf16 %v688_v8, %v686_v7  ;;  %v1323_v4 = vpack.c.bf16 %v729_v25, %v727_v3  ;;  %v745_v3 = vld [vmem:[%s2455_s6 + $0x278] sm:$0xff] }
 0x197   :  { %1254 = vmatpush1.bf16.msra.mxu0 %v1253_v10  ;;  %v693_v10 = vld [vmem:[%s2455_s6 + $0xd8] sm:$0xff] }
 0x198   :  { %1256 = vmatprep.subr.bf16.mxu0 %v1255_v14  ;;  %v1287_v12 = vpack.c.bf16 %v693_v10, %v691_v9  ;;  %v692_v14 = vld [vmem:[%s2455_s6 + $0xd0] sm:$0xff]  ;;  %v731_v10 = vld [vmem:[%s2455_s6 + $0x208] sm:$0xff] }
 0x19a   :  { %v1407_v62 = vpop.eup %1406 }
 0x19b   :  { %v161_v63 = vsel %vm148_vm0, %v1407_v62, 0.0  ;;  %1258 = vmatpush1.bf16.msra.mxu0 %v1257_v18  ;;  %v1291_v18 = vpack.c.bf16 %v697_v16, %v695_v15 }
 0x19c   :  { %162 = vadd.xlane.f32.xlu1 %v161_v63  ;;  %1260 = vmatprep.subr.bf16.mxu0 %v1259_v22  ;;  %v680_v63 = vld [vmem:[%s2455_s6 + $0x70] sm:$0xff]  ;;  %v701_v22 = vld [vmem:[%s2455_s6 + $0x118] sm:$0xff] }
 0x19d   :  { %v1295_v24 = vpack.c.bf16 %v701_v22, %v699_v21 }
 0x19e   :  { %v1409_v0 = vpop.eup %1408 }
 0x19f   :  { %v164_v1 = vsel %vm148_vm0, %v1409_v0, 0.0  ;;  %1262 = vmatpush1.bf16.msra.mxu0 %v1261_v26  ;;  %v698_v26 = vld [vmem:[%s2455_s6 + $0x100] sm:$0xff] }
 0x1a0   :  { %165 = vadd.xlane.f32.xlu1 %v164_v1  ;;  %v685_v1 = vld [vmem:[%s2455_s6 + $0x98] sm:$0xff] }
 0x1a2   :  { %638 = vmatmul.mubr.f32.vlgmr.msra.gmra.mrb[8].mxu0 %v1592_v49 }
 0x1a3   :  { %643 = vmatprep.mubr.f32.mxu0 %v1597_v50 }
 0x1a6   :  { %644 = vmatmul.mubr.f32.gmra.mrb[10].mxu0 %v1604_v51 }
 0x1f4   :  { %v2026_v35 = vpop.f32.mrb[4].mxu0 }
 0x1f5   :  { %v2029_v49 = vpop.f32.mrb[5].mxu0 }
 0x1f8   :  { %v568_v8 = vpop.f32.mrb[6].mxu0 }
 0x1f9   :  { %v570_v9 = vpop.f32.mrb[7].mxu0 }
 0x229   :  { %v163_v29 = vpop.xlane.xlu1 %162 }
 0x22a   :  { %1410 = vrcp.f32 %v163_v29  ;;  %v705_v29 = vld [vmem:[%s2455_s6 + $0x138] sm:$0xff] }
 0x22d   :  { %v166_v30 = vpop.xlane.xlu1 %165 }
 0x22e   :  { %1412 = vrcp.f32 %v166_v30 }
 0x234   :  { %v1411_v32 = vpop.eup %1410 }
 0x235   :  { %v169_v33 = vmul.f32 %v1411_v32, %v1407_v62  ;;  %v678_v62 = vld [vmem:[%s2455_s6 + $0x60] sm:$0xff] }
 0x236   :  { %v1277_v57 = vpack.c.bf16 %v680_v63, %v678_v62  ;;  %v702_v32 = vld [vmem:[%s2455_s6 + $0x120] sm:$0xff]  ;;  %v723_v62 = vld [vmem:[%s2455_s6 + $0x1c8] sm:$0xff]  ;;  %v725_v63 = vld [vmem:[%s2455_s6 + $0x1d8] sm:$0xff] }
 0x237   :  { %1055 = vmatmul.mubr.msk.f32.vlgmr.msra.gmra.mrb[0].mxu1 %vm148_vm0, %v169_v33 }
 0x238   :  { %v1413_v50 = vpop.eup %1412  ;;  %262 = vmatprep.mubr.f32.mxu1 %v1438_v17  ;;  %1058 = vmatpush1.msk.msra.mxu1 %vm183_vm1, %v172_v27  ;;  %v700_v27 = vld [vmem:[%s2455_s6 + $0x110] sm:$0xff] }
 0x239   :  { %v170_v51 = vmul.f32 %v1413_v50, %v1409_v0  ;;  %1061 = vmatprep.subr.msk.mxu1 %vm183_vm1, %v796_v34  ;;  %v683_v0 = vld [vmem:[%s2455_s6 + $0x88] sm:$0xff]  ;;  %v1297_v30 = vpack.c.bf16 %v700_v27, %v698_v26  ;;  %v709_v50 = vld [vmem:[%s2455_s6 + $0x158] sm:$0xff] }
 0x23a   :  { %v1279_v2 = vpack.c.bf16 %v685_v1, %v683_v0  ;;  %v707_v34 = vld [vmem:[%s2455_s6 + $0x148] sm:$0xff]  ;;  %v1319_v1 = vpack.c.bf16 %v725_v63, %v723_v62 }
 0x23b   :  { %1056 = vmatmul.mubr.msk.f32.gmra.mrb[2].mxu1 %vm148_vm0, %v170_v51  ;;  %v1303_v36 = vpack.c.bf16 %v709_v50, %v707_v34  ;;  %v730_v50 = vld [vmem:[%s2455_s6 + $0x200] sm:$0xff] }
 0x23c   :  { %333 = vmatprep.mubr.f32.mxu1 %v1438_v17 }
 0x23f   :  { %1059 = vmatmul.mubr.msk.f32.vlgmr.msra.gmra.mrb[4].mxu1 %vm148_vm0, %v169_v33 }
 0x240   :  { %339 = vmatprep.mubr.f32.mxu1 %v1438_v17  ;;  %1062 = vmatpush1.msk.msra.mxu1 %vm183_vm1, %v794_v31  ;;  %v1299_v31 = vpack.c.bf16 %v705_v29, %v703_v28 }
 0x241   :  { %1264 = vmatprep.subr.bf16.mxu1 %v1263_v38  ;;  %v708_v38 = vld [vmem:[%s2455_s6 + $0x150] sm:$0xff] }
 0x242   :  { %v1305_v41 = vpack.c.bf16 %v708_v38, %v706_v37 }
 0x243   :  { %1060 = vmatmul.mubr.msk.f32.gmra.mrb[6].mxu1 %vm148_vm0, %v170_v51 }
 0x244   :  { %865 = vmatprep.mubr.f32.mxu1 %v1438_v17 }
 0x247   :  { %1063 = vmatmul.mubr.msk.f32.vlgmr.msra.gmra.mrb[8].mxu1 %vm148_vm0, %v169_v33  ;;  %v704_v33 = vld [vmem:[%s2455_s6 + $0x130] sm:$0xff] }
 0x248   :  { %871 = vmatprep.mubr.f32.mxu1 %v1438_v17  ;;  %1266 = vmatpush1.bf16.msra.mxu1 %v1265_v43  ;;  %v1289_v17 = vpack.c.bf16 %v692_v14, %v690_v13  ;;  %v710_v43 = vld [vmem:[%s2455_s6 + $0x160] sm:$0xff] }
 0x249   :  { %1268 = vmatprep.subr.bf16.mxu1 %v1267_v44  ;;  %v712_v44 = vld [vmem:[%s2455_s6 + $0x170] sm:$0xff] }
 0x24a   :  { %v1309_v47 = vpack.c.bf16 %v712_v44, %v710_v43 }
 0x24b   :  { %1064 = vmatmul.mubr.msk.f32.gmra.mrb[10].mxu1 %vm148_vm0, %v170_v51  ;;  %v1301_v51 = vpack.c.bf16 %v704_v33, %v702_v32 }
 0x24c   :  { %1270 = vmatpush1.bf16.msra.mxu1 %v1269_v52  ;;  %v714_v52 = vld [vmem:[%s2455_s6 + $0x180] sm:$0xff] }
 0x24d   :  { %1272 = vmatprep.subr.bf16.mxu1 %v1271_v53  ;;  %v716_v53 = vld [vmem:[%s2455_s6 + $0x190] sm:$0xff] }
 0x24e   :  { %v1313_v56 = vpack.c.bf16 %v716_v53, %v714_v52  ;;  %v739_v52 = vld [vmem:[%s2455_s6 + $0x248] sm:$0xff]  ;;  %v741_v53 = vld [vmem:[%s2455_s6 + $0x258] sm:$0xff] }
 0x250   :  { %1274 = vmatpush1.bf16.msra.mxu1 %v1273_v59  ;;  %v718_v59 = vld [vmem:[%s2455_s6 + $0x1a0] sm:$0xff] }
 0x251   :  { %1276 = vmatprep.subr.bf16.mxu1 %v1275_v60  ;;  %v720_v60 = vld [vmem:[%s2455_s6 + $0x1b0] sm:$0xff] }
 0x252   :  { %v1317_v0 = vpack.c.bf16 %v720_v60, %v718_v59 }
 0x254   :  { %1278 = vmatpush1.bf16.msra.mxu1 %v1277_v57  ;;  %v722_v57 = vld [vmem:[%s2455_s6 + $0x1c0] sm:$0xff] }
 0x255   :  { %1280 = vmatprep.subr.bf16.mxu1 %v1279_v2  ;;  %v724_v2 = vld [vmem:[%s2455_s6 + $0x1d0] sm:$0xff] }
 0x256   :  { %v1321_v61 = vpack.c.bf16 %v724_v2, %v722_v57  ;;  %v740_v57 = vld [vmem:[%s2455_s6 + $0x250] sm:$0xff] }
 0x258   :  { %1282 = vmatpush1.bf16.msra.mxu1 %v1281_v5  ;;  %v726_v5 = vld [vmem:[%s2455_s6 + $0x1e0] sm:$0xff] }
 0x259   :  { %1284 = vmatprep.subr.bf16.mxu1 %v1283_v6  ;;  %v728_v6 = vld [vmem:[%s2455_s6 + $0x1f0] sm:$0xff] }
 0x25a   :  { %v1325_v7 = vpack.c.bf16 %v728_v6, %v726_v5 }
 0x25c   :  { %1286 = vmatpush1.bf16.msra.mxu1 %v1285_v11  ;;  %v733_v11 = vld [vmem:[%s2455_s6 + $0x218] sm:$0xff] }
 0x25d   :  { %1288 = vmatprep.subr.bf16.mxu1 %v1287_v12  ;;  %v1327_v12 = vpack.c.bf16 %v733_v11, %v731_v10  ;;  %v742_v10 = vld [vmem:[%s2455_s6 + $0x260] sm:$0xff]  ;;  %v744_v11 = vld [vmem:[%s2455_s6 + $0x270] sm:$0xff] }
 0x260   :  { %1290 = vmatpush1.bf16.msra.mxu1 %v1289_v17  ;;  %v476_v17 = vlaneseq }
 0x261   :  { %1292 = vmatprep.subr.bf16.mxu1 %v1291_v18 }
 0x262   :  { %v477_v18 = vshrl.u32 %v476_v17, 7 }
 0x264   :  { %1294 = vmatpush1.bf16.msra.mxu1 %v1293_v23  ;;  %v478_v19 = vsub.s32 0, %v477_v18  ;;  %v482_v21 = vsub.s32 1, %v477_v18  ;;  %v486_v26 = vsub.s32 2, %v477_v18  ;;  %v490_v28 = vsub.s32 3, %v477_v18 }
 0x265   :  { %1296 = vmatprep.subr.bf16.mxu1 %v1295_v24  ;;  %v1341_v18 = vpack.c.bf16 %v744_v11, %v742_v10  ;;  %v782_v11 = vld [vmem:[%s2455_s6 + $0x3a0] sm:$0xff] }
 0x266   :  { %v479_v22 = vrot.slane %v474_v20, %v478_v19  ;;  %v483_v23 = vrot.slane %v474_v20, %v482_v21  ;;  %v491_v34 = vrot.slane %v474_v20, %v490_v28  ;;  %v748_v21 = vld [vmem:[%s2455_s6 + $0x290] sm:$0xff] }
 0x267   :  { %v752_v28 = vld [vmem:[%s2455_s6 + $0x2b0] sm:$0xff] }
 0x268   :  { %1298 = vmatpush1.bf16.msra.mxu1 %v1297_v30  ;;  %v563_v24 = vadd.f32 %v2026_v35, %v479_v22  ;;  %v565_v27 = vadd.f32 %v2029_v49, %v483_v23  ;;  %v569_v30 = vadd.f32 %v568_v8, %v479_v22  ;;  %v571_v33 = vadd.f32 %v570_v9, %v483_v23  ;;  %v735_v35 = vld [vmem:[%s2455_s6 + $0x228] sm:$0xff]  ;;  %v737_v49 = vld [vmem:[%s2455_s6 + $0x238] sm:$0xff] }
 0x269   :  { %1300 = vmatprep.subr.bf16.mxu1 %v1299_v31  ;;  %v487_v31 = vrot.slane %v474_v20, %v486_v26  ;;  %v1331_v45 = vpack.c.bf16 %v737_v49, %v735_v35  ;;  %v746_v20 = vld [vmem:[%s2455_s6 + $0x280] sm:$0xff]  ;;  %v751_v22 = vld [vmem:[%s2455_s6 + $0x2a8] sm:$0xff]  ;;  %v753_v23 = vld [vmem:[%s2455_s6 + $0x2b8] sm:$0xff] }
 0x26a   :  { %v650_v29 = vmax.f32 %v563_v24, 0.0  ;;  %v651_v32 = vmax.f32 %v565_v27, 0.0  ;;  %v654_v38 = vmax.f32 %v569_v30, 0.0  ;;  %v1345_v24 = vpack.c.bf16 %v748_v21, %v746_v20  ;;  %v750_v27 = vld [vmem:[%s2455_s6 + $0x2a0] sm:$0xff]  ;;  %v757_v30 = vld [vmem:[%s2455_s6 + $0x2d8] sm:$0xff]  ;;  %v788_v20 = vld [vmem:[%s2455_s6 + $0x3d0] sm:$0xff] }
 0x26b   :  { %v1347_v26 = vpack.c.bf16 %v753_v23, %v751_v22  ;;  %v758_v49 = vld [vmem:[%s2455_s6 + $0x2e0] sm:$0xff]  ;;  %v791_v21 = vld [vmem:[%s2455_s6 + $0x3e8] sm:$0xff]  ;;  %v793_v22 = vld [vmem:[%s2455_s6 + $0x3f8] sm:$0xff] }
 0x26c   :  { %1302 = vmatpush1.bf16.msra.mxu1 %v1301_v51  ;;  %v732_v51 = vld [vmem:[%s2455_s6 + $0x210] sm:$0xff] }
 0x26d   :  { %1304 = vmatprep.subr.bf16.mxu1 %v1303_v36  ;;  %v1329_v44 = vpack.c.bf16 %v732_v51, %v730_v50  ;;  %v759_v50 = vld [vmem:[%s2455_s6 + $0x2e8] sm:$0xff]  ;;  %v761_v51 = vld [vmem:[%s2455_s6 + $0x2f8] sm:$0xff] }
 0x26e   :  { %v1355_v35 = vpack.c.bf16 %v761_v51, %v759_v50 }
 0x270   :  { %1306 = vmatpush1.bf16.msra.mxu1 %v1305_v41 }
 0x271   :  { %1308 = vmatprep.subr.bf16.mxu1 %v1307_v42  ;;  %v655_v42 = vmax.f32 %v571_v33, 0.0  ;;  %v754_v33 = vld [vmem:[%s2455_s6 + $0x2c0] sm:$0xff] }
 0x274   :  { %1310 = vmatpush1.bf16.msra.mxu1 %v1309_v47  ;;  %v736_v47 = vld [vmem:[%s2455_s6 + $0x230] sm:$0xff] }
 0x275   :  { %1312 = vmatprep.subr.bf16.mxu1 %v1311_v48  ;;  %v639_v13 = vpop.f32.mrb[8].mxu0  ;;  %v1333_v63 = vpack.c.bf16 %v736_v47, %v734_v46 }
 0x276   :  { %v641_v14 = vpop.f32.mrb[9].mxu0  ;;  %v640_v40 = vadd.f32 %v639_v13, %v487_v31  ;;  %v747_v13 = vld [vmem:[%s2455_s6 + $0x288] sm:$0xff] }
 0x277   :  { %v642_v43 = vadd.f32 %v641_v14, %v491_v34  ;;  %v749_v14 = vld [vmem:[%s2455_s6 + $0x298] sm:$0xff] }
 0x278   :  { %1314 = vmatpush1.bf16.msra.mxu1 %v1313_v56  ;;  %v652_v55 = vmax.f32 %v640_v40, 0.0  ;;  %v1343_v19 = vpack.c.bf16 %v749_v14, %v747_v13  ;;  %v787_v13 = vld [vmem:[%s2455_s6 + $0x3c8] sm:$0xff]  ;;  %v789_v14 = vld [vmem:[%s2455_s6 + $0x3d8] sm:$0xff] }
 0x279   :  { %1316 = vmatprep.subr.bf16.mxu1 %v1315_v58  ;;  %v645_v15 = vpop.f32.mrb[10].mxu0  ;;  %v653_v60 = vmax.f32 %v642_v43, 0.0  ;;  %v764_v43 = vld [vmem:[%s2455_s6 + $0x310] sm:$0xff] }
 0x27a   :  { %v647_v16 = vpop.f32.mrb[11].mxu0  ;;  %v646_v58 = vadd.f32 %v645_v15, %v487_v31  ;;  %v1349_v31 = vpack.c.bf16 %v752_v28, %v750_v27  ;;  %v792_v27 = vld [vmem:[%s2455_s6 + $0x3f0] sm:$0xff] }
 0x27b   :  { %v648_v62 = vadd.f32 %v647_v16, %v491_v34  ;;  %v756_v34 = vld [vmem:[%s2455_s6 + $0x2d0] sm:$0xff] }
 0x27c   :  { %1318 = vmatpush1.bf16.msra.mxu1 %v1317_v0  ;;  %v1335_v0 = vpack.c.bf16 %v741_v53, %v739_v52  ;;  %v768_v52 = vld [vmem:[%s2455_s6 + $0x330] sm:$0xff]  ;;  %v771_v53 = vld [vmem:[%s2455_s6 + $0x348] sm:$0xff] }
 0x27d   :  { %1320 = vmatprep.subr.bf16.mxu1 %v1319_v1  ;;  %v738_v1 = vld [vmem:[%s2455_s6 + $0x240] sm:$0xff] }
 0x27e   :  { %v1337_v8 = vpack.c.bf16 %v740_v57, %v738_v1  ;;  %v774_v1 = vld [vmem:[%s2455_s6 + $0x360] sm:$0xff]  ;;  %v776_v57 = vld [vmem:[%s2455_s6 + $0x370] sm:$0xff] }
 0x280   :  { %1322 = vmatpush1.bf16.msra.mxu1 %v1321_v61  ;;  %v743_v61 = vld [vmem:[%s2455_s6 + $0x268] sm:$0xff] }
 0x281   :  { %1324 = vmatprep.subr.bf16.mxu1 %v1323_v4  ;;  %v656_v4 = vmax.f32 %v646_v58, 0.0  ;;  %v1339_v9 = vpack.c.bf16 %v745_v3, %v743_v61  ;;  %v770_v58 = vld [vmem:[%s2455_s6 + $0x340] sm:$0xff]  ;;  %v781_v61 = vld [vmem:[%s2455_s6 + $0x398] sm:$0xff]  ;;  %v1373_v3 = vpack.c.bf16 %v776_v57, %v774_v1 }
 0x284   :  { %1326 = vmatpush1.bf16.msra.mxu1 %v1325_v7  ;;  %v657_v7 = vmax.f32 %v648_v62, 0.0  ;;  %v777_v62 = vld [vmem:[%s2455_s6 + $0x378] sm:$0xff] }
 0x285   :  { %1328 = vmatprep.subr.bf16.mxu1 %v1327_v12 }
 0x30a   :  { %v258_v36 = vpop.f32.mrb[0].mxu1 }
 0x30b   :  { %v658_v37 = vmul.f32 %v650_v29, %v258_v36  ;;  %v260_v39 = vpop.f32.mrb[1].mxu1  ;;  %v755_v29 = vld [vmem:[%s2455_s6 + $0x2c8] sm:$0xff]  ;;  %v1353_v36 = vpack.c.bf16 %v756_v34, %v754_v33 }
 0x30c   :  { %v659_v41 = vmul.f32 %v651_v32, %v260_v39  ;;  %v1351_v32 = vpack.c.bf16 %v757_v30, %v755_v29  ;;  %v765_v39 = vld [vmem:[%s2455_s6 + $0x318] sm:$0xff] }
 0x30e   :  { %v264_v48 = vpop.f32.mrb[2].mxu1  ;;  %942 = vmatprep.mubr.f32.mxu1 %v659_v41 }
 0x30f   :  { %v662_v54 = vmul.f32 %v654_v38, %v264_v48  ;;  %v266_v56 = vpop.f32.mrb[3].mxu1  ;;  %943 = vmatmul.mubr.f32.vlgmr.msra.gmra.mrb[8].mxu1 %v658_v37  ;;  %v760_v37 = vld [vmem:[%s2455_s6 + $0x2f0] sm:$0xff]  ;;  %v763_v38 = vld [vmem:[%s2455_s6 + $0x308] sm:$0xff]  ;;  %v766_v48 = vld [vmem:[%s2455_s6 + $0x320] sm:$0xff] }
 0x310   :  { %v663_v59 = vmul.f32 %v655_v42, %v266_v56  ;;  %1330 = vmatpush1.bf16.msra.mxu1 %v1329_v44  ;;  %v1357_v40 = vpack.c.bf16 %v760_v37, %v758_v49  ;;  %v1359_v41 = vpack.c.bf16 %v765_v39, %v763_v38  ;;  %v762_v42 = vld [vmem:[%s2455_s6 + $0x300] sm:$0xff]  ;;  %v767_v44 = vld [vmem:[%s2455_s6 + $0x328] sm:$0xff] }
 0x311   :  { %1332 = vmatprep.subr.bf16.mxu1 %v1331_v45  ;;  %v769_v45 = vld [vmem:[%s2455_s6 + $0x338] sm:$0xff]  ;;  %v1361_v46 = vpack.c.bf16 %v764_v43, %v762_v42 }
 0x312   :  { %v335_v2 = vpop.f32.mrb[4].mxu1  ;;  %948 = vmatprep.mubr.f32.mxu1 %v663_v59  ;;  %v1363_v47 = vpack.c.bf16 %v769_v45, %v767_v44  ;;  %v772_v59 = vld [vmem:[%s2455_s6 + $0x350] sm:$0xff] }
 0x313   :  { %v2278_v25 = vmul.f32 %v652_v55, %v335_v2  ;;  %v337_v5 = vpop.f32.mrb[5].mxu1  ;;  %949 = vmatmul.mubr.f32.gmra.mrb[10].mxu1 %v662_v54  ;;  %v773_v54 = vld [vmem:[%s2455_s6 + $0x358] sm:$0xff]  ;;  %v1365_v55 = vpack.c.bf16 %v768_v52, %v766_v48  ;;  %v779_v2 = vld [vmem:[%s2455_s6 + $0x388] sm:$0xff] }
 0x314   :  { %v661_v6 = vmul.f32 %v653_v60, %v337_v5  ;;  %1334 = vmatpush1.bf16.msra.mxu1 %v1333_v63  ;;  %v1367_v56 = vpack.c.bf16 %v773_v54, %v771_v53  ;;  %v775_v60 = vld [vmem:[%s2455_s6 + $0x368] sm:$0xff]  ;;  %v1369_v63 = vpack.c.bf16 %v772_v59, %v770_v58  ;;  %v778_v5 = vld [vmem:[%s2455_s6 + $0x380] sm:$0xff] }
 0x315   :  { %1336 = vmatprep.subr.bf16.mxu1 %v1335_v0  ;;  %v1371_v0 = vpack.c.bf16 %v777_v62, %v775_v60 }
 0x316   :  { %v341_v12 = vpop.f32.mrb[6].mxu1  ;;  %1019 = vmatprep.mubr.f32.mxu1 %v661_v6  ;;  %v780_v6 = vld [vmem:[%s2455_s6 + $0x390] sm:$0xff] }
 0x317   :  { %v2292_v15 = vmul.f32 %v656_v4, %v341_v12  ;;  %v343_v16 = vpop.f32.mrb[7].mxu1  ;;  %v1375_v4 = vpack.c.bf16 %v781_v61, %v779_v2  ;;  %v784_v12 = vld [vmem:[%s2455_s6 + $0x3b0] sm:$0xff] }
 0x318   :  { %v2294_v17 = vmul.f32 %v657_v7, %v343_v16  ;;  %1338 = vmatpush1.bf16.msra.mxu1 %v1337_v8  ;;  %v783_v7 = vld [vmem:[%s2455_s6 + $0x3a8] sm:$0xff]  ;;  %v785_v8 = vld [vmem:[%s2455_s6 + $0x3b8] sm:$0xff]  ;;  %v1381_v16 = vpack.c.bf16 %v784_v12, %v782_v11 }
 0x319   :  { %1340 = vmatprep.subr.bf16.mxu1 %v1339_v9  ;;  %v1377_v9 = vpack.c.bf16 %v780_v6, %v778_v5  ;;  %v1379_v10 = vpack.c.bf16 %v785_v8, %v783_v7 }
 0x31c   :  { %1342 = vmatpush1.bf16.msra.mxu1 %v1341_v18  ;;  %v1383_v18 = vpack.c.bf16 %v789_v14, %v787_v13 }
 0x31d   :  { %1344 = vmatprep.subr.bf16.mxu1 %v1343_v19  ;;  %v786_v19 = vld [vmem:[%s2455_s6 + $0x3c0] sm:$0xff] }
 0x31e   :  { %v1385_v23 = vpack.c.bf16 %v788_v20, %v786_v19 }
 0x320   :  { %1346 = vmatpush1.bf16.msra.mxu1 %v1345_v24  ;;  %v1387_v24 = vpack.c.bf16 %v793_v22, %v791_v21 }
 0x321   :  { %1348 = vmatprep.subr.bf16.mxu1 %v1347_v26  ;;  %v790_v26 = vld [vmem:[%s2455_s6 + $0x3e0] sm:$0xff]  ;;  %s1414_s6 = scalar_lea.vmem %s1042_s7, 512 }
 0x322   :  { %v1389_v28 = vpack.c.bf16 %v792_v27, %v790_v26  ;;  %p1415_p0 = scmp.ne.s32.totalorder %s1042_s7, %s1414_s6  ;;  %p1420_p2 = scmp.lt.s32.totalorder %s1414_s6, %s1414_s6 }
 0x324   :  { %1350 = vmatpush1.bf16.msra.mxu1 %v1349_v31  ;;  %p1421_p3 = por %p1420_p2, %p1419_p1 }
 0x325   :  { %1352 = vmatprep.subr.bf16.mxu1 %v1351_v32 }
 0x326   :  { %p1422_p4 = pnand %p1421_p3, %p1415_p0 }
 0x328   :  { %1354 = vmatpush1.bf16.msra.mxu1 %v1353_v36 }
 0x329   :  { %1356 = vmatprep.subr.bf16.mxu1 %v1355_v35 }
 0x32c   :  { %1358 = vmatpush1.bf16.msra.mxu1 %v1357_v40 }
 0x32d   :  { %1360 = vmatprep.subr.bf16.mxu1 %v1359_v41 }
 0x330   :  { %1362 = vmatpush1.bf16.msra.mxu1 %v1361_v46 }
 0x331   :  { %1364 = vmatprep.subr.bf16.mxu1 %v1363_v47 }
 0x334   :  { %1366 = vmatpush1.bf16.msra.mxu1 %v1365_v55 }
 0x335   :  { %1368 = vmatprep.subr.bf16.mxu1 %v1367_v56 }
 0x338   :  { %1370 = vmatpush1.bf16.msra.mxu1 %v1369_v63 }
 0x339   :  { %1372 = vmatprep.subr.bf16.mxu1 %v1371_v0 }
 0x33c   :  { %1374 = vmatpush1.bf16.msra.mxu1 %v1373_v3 }
 0x33d   :  { %1376 = vmatprep.subr.bf16.mxu1 %v1375_v4 }
 0x340   :  { %1378 = vmatpush1.bf16.msra.mxu1 %v1377_v9 }
 0x341   :  { %1380 = vmatprep.subr.bf16.mxu1 %v1379_v10 }
 0x344   :  { %1382 = vmatpush1.bf16.msra.mxu1 %v1381_v16 }
 0x345   :  { %1384 = vmatprep.subr.bf16.mxu1 %v1383_v18 }
 0x348   :  { %1386 = vmatpush1.bf16.msra.mxu1 %v1385_v23 }
 0x349   :  { %1388 = vmatprep.subr.bf16.mxu1 %v1387_v24 }
 0x34c   :  { %1390 = vmatpush1.bf16.msra.mxu1 %v1389_v28 }
 0x34f   :  { %1020 = vmatmul.mubr.f32.vlgmr.msra.gmra.mrb[8].mxu1 %v2278_v25 }
 0x350   :  { %1025 = vmatprep.mubr.f32.mxu1 %v2294_v17 }
 0x353   :  { %1026 = vmatmul.mubr.f32.gmra.mrb[10].mxu1 %v2292_v15 }
 0x422   :  { %v1021_v29 = vpop.f32.mrb[8].mxu1 }
 0x423   :  { %1032 = vst [vmem:[#allocation2] sm:$0xff] %v1021_v29  ;;  %v1023_v30 = vpop.f32.mrb[9].mxu1 }
 0x424   :  { %1033 = vst [vmem:[#allocation2 + $0x8] sm:$0xff] %v1023_v30 }
 0x426   :  { %v1027_v31 = vpop.f32.mrb[10].mxu1 }
 0x427   :  { %1034 = vst [vmem:[#allocation2 + $0x10] sm:$0xff] %v1027_v31  ;;  %v1029_v32 = vpop.f32.mrb[11].mxu1 }
 0x428   :  { %1035 = vst [vmem:[#allocation2 + $0x18] sm:$0xff] %v1029_v32 }
 0x429   :  { %1425 = shalt.err (!%p1422_p4)
}
 0x42a   :  { %s1426_s24 = scalar_lea.hbm %s2457_s8, 512 }
 0x42b   :  { %p1427_p5 = scmp.ne.s32.totalorder %s2457_s8, %s1426_s24  ;;  %p1430_p6 = scmp.lt.u32.totalorder %s1426_s24, %s2457_s8 }
 0x42d   :  { %p1432_p7 = pnand %p1430_p6, %p1427_p5 }
 0x42f   :  { %1435 = shalt.err (!%p1432_p7)
}
 0x430   :  { %s1440_s29 = smov 256   ;;  %s1441_s30 = smov 16  }
 0x431   :  { %1047 = dma.vmem_to_hbm [thread:$0]  %s1042_s7, 512, %s2457_s8, [#allocation3], %s1440_s29, %s1440_s29, %s1441_s30  }
 0x432   :  { %1436 = dma.done.wait [#allocation3], 512  }
 0x433   :  { %1437 = vsyncadd [#allocation3], 4294966784 }
 0x434   :  { %1051 = vsyncpa [#allocation3], 1 }

</bundles_post_ra>
